<compile_context>
chip_gen: v6e
topology: v6e:2x2x1
jax: 0.10.0
libtpu: 0.0.40
codegen_flags: <defaults>
</compile_context>

<pallas_src>
import functools

import jax
import jax.numpy as jnp
from jax.experimental import pallas as pl
from jax.experimental.pallas import tpu as pltpu


def _choose_chunk(T, bt, H, budget_bytes=4 * 1024 * 1024):
    """Largest divisor of T whose (TC, bt, 4H) f32 gates chunk fits the budget."""
    step_bytes = bt * 4 * H * 4
    max_tc = max(1, budget_bytes // step_bytes)
    tc = 1
    for d in range(1, T + 1):
        if T % d == 0 and d <= max_tc:
            tc = d
    return tc


def _vmem_bytes(T, bt, I, H, O, num_layers, TC):
    """Rough resident-VMEM estimate for the kernel (f32)."""
    f = 4
    b = T * bt * I * f * 2                       # x window (double-buffered)
    for l in range(num_layers):
        in_dim = I if l == 0 else H
        b += (in_dim * 4 * H + H * 4 * H + 4 * H) * f
    b += (H * O + O) * f                         # fc weights
    b += T * bt * H * f                          # inter-layer sequence scratch
    b += TC * bt * 4 * H * f                     # gates chunk scratch
    b += bt * O * f * 2                          # output window
    return b


def _make_lstm_kernel(num_layers, T, bt, input_size, H, out_size, TC,
                      matmul_dtype, unroll):
    """Kernel closed over static sizes.

    Argument order:
      x_ref (T, bt, I),
      [w_ih_T_ref, w_hh_T_ref, bias_ref] x num_layers,
      w_fc_T_ref, b_fc_ref,
      out_ref (bt, O),
      seq_ref (T, bt, H) VMEM scratch, gates_ref (TC, bt, 4H) VMEM scratch.
    """
    four_h = 4 * H
    num_chunks = T // TC
    gate_aligned = (H % 128 == 0)   # per-gate slices hit whole 128-lane groups

    def kernel(*args):
        x_ref = args[0]
        idx = 1
        layer_params = []
        for _ in range(num_layers):
            layer_params.append((args[idx], args[idx + 1], args[idx + 2]))
            idx += 3
        w_fc_ref, b_fc_ref = args[idx], args[idx + 1]
        out_ref = args[idx + 2]
        seq_ref = args[idx + 3]
        gates_ref = args[idx + 4]

        h = None
        for layer in range(num_layers):
            w_ih_ref, w_hh_ref, b_ref = layer_params[layer]
            w_ih = w_ih_ref[...].astype(matmul_dtype)    # (in_dim, 4H)
            w_hh = w_hh_ref[...]                         # (H, 4H) -- recurrent stays f32
            bias = b_ref[...]                            # (1, 4H)

            in_ref = x_ref if layer == 0 else seq_ref
            in_dim = input_size if layer == 0 else H
            write_seq = layer < num_layers - 1           # top layer's seq is dead

            h = jnp.zeros((bt, H), jnp.float32)
            c = jnp.zeros((bt, H), jnp.float32)

            # Static chunk loop over T (bounds the resident gates buffer and
            # keeps the per-chunk input projection as one big MXU matmul).
            for chunk in range(num_chunks):
                t0 = chunk * TC
                chunk_in = in_ref[pl.ds(t0, TC)].reshape(TC * bt, in_dim)
                gates_ref[...] = (
                    jnp.dot(chunk_in.astype(matmul_dtype), w_ih,
                            preferred_element_type=jnp.float32)
                    + bias
                ).reshape(TC, bt, four_h)

                def step(t, carry, _t0=t0, _write_seq=write_seq, _w_hh=w_hh):
                    h, c = carry
                    # Serial per-step path: one small f32 MXU matmul + gates.
                    gates = gates_ref[t] + jnp.dot(
                        h, _w_hh, preferred_element_type=jnp.float32)  # (bt, 4H)

                    if gate_aligned:
                        # Lane-aligned per-gate activations: 5H EUP elems/row.
                        i_g = jax.nn.sigmoid(gates[:, 0 * H:1 * H])
                        f_g = jax.nn.sigmoid(gates[:, 1 * H:2 * H])
                        g_g = jnp.tanh(gates[:, 2 * H:3 * H])
                        o_g = jax.nn.sigmoid(gates[:, 3 * H:4 * H])
                    else:
                        # H < 128: per-gate slices would be lane-masked; two
                        # full-width passes avoid the masked VPU/XLU work.
                        sig = jax.nn.sigmoid(gates)
                        tnh = jnp.tanh(gates)
                        i_g = sig[:, 0 * H:1 * H]
                        f_g = sig[:, 1 * H:2 * H]
                        g_g = tnh[:, 2 * H:3 * H]
                        o_g = sig[:, 3 * H:4 * H]

                    c = f_g * c + i_g * g_g
                    h = o_g * jnp.tanh(c)

                    if _write_seq:
                        seq_ref[_t0 + t] = h   # sublane-aligned single vst
                    return h, c

                h, c = jax.lax.fori_loop(0, TC, step, (h, c), unroll=unroll)

        # out = fc(out[:, -1, :]); h is the top layer's last-step hidden.
        out_ref[...] = (
            jnp.dot(h.astype(matmul_dtype), w_fc_ref[...].astype(matmul_dtype),
                    preferred_element_type=jnp.float32)
            + b_fc_ref[...]
        )

    return kernel


def simple_lstm_forward(x, params, *, hidden_size, num_layers, output_size,
                        matmul_dtype=jnp.float32, batch_tile=8):
    """x: (B, T, I) float32 (batch_first). params: dict of pre-transposed weights.

    matmul_dtype=jnp.bfloat16 applies only to the hoisted input projection and
    the final FC (f32 accumulate); the recurrent h @ W_hh matmul and all gate /
    state math stay f32.  Default f32 keeps the check below exact.
    """
    B, T, I = x.shape
    H = hidden_size
    bt = batch_tile                              # 8-sublane batch tile per program
    B_pad = ((B + bt - 1) // bt) * bt

    # Time-major (T, B_pad, I): every per-step tile is a full sublane group.
    x_tm = jnp.transpose(x, (1, 0, 2))
    if B_pad != B:
        x_tm = jnp.pad(x_tm, ((0, 0), (0, B_pad - B), (0, 0)))

    TC = _choose_chunk(T, bt, H)
    unroll = max(1, min(8, TC))
    kernel = _make_lstm_kernel(num_layers, T, bt, I, H, output_size, TC,
                               matmul_dtype, unroll)

    inputs = [x_tm]
    in_specs = [pl.BlockSpec((T, bt, I), lambda b: (0, b, 0))]
    for l in range(num_layers):
        for name in (f"w_ih_T_{l}", f"w_hh_T_{l}", f"b_{l}"):
            w = params[name]
            inputs.append(w)
            in_specs.append(pl.BlockSpec(w.shape, lambda b: (0, 0)))
    for name in ("w_fc_T", "b_fc"):
        w = params[name]
        inputs.append(w)
        in_specs.append(pl.BlockSpec(w.shape, lambda b: (0, 0)))

    est = _vmem_bytes(T, bt, I, H, output_size, num_layers, TC)
    vmem_limit = int(min(64 * 1024 * 1024, max(32 * 1024 * 1024, 2 * est)))

    out_pad = pl.pallas_call(
        kernel,
        out_shape=jax.ShapeDtypeStruct((B_pad, output_size), jnp.float32),
        grid=(B_pad // bt,),
        in_specs=in_specs,
        out_specs=pl.BlockSpec((bt, output_size), lambda b: (b, 0)),
        scratch_shapes=[
            pltpu.VMEM((T, bt, H), jnp.float32),        # inter-layer sequence
            pltpu.VMEM((TC, bt, 4 * H), jnp.float32),   # hoisted-gates chunk
        ],
        compiler_params=pltpu.CompilerParams(
            dimension_semantics=("parallel",),          # batch tiles -> both v7x TCs
            vmem_limit_bytes=vmem_limit,
        ),
    )(*inputs)
    return out_pad[:B]


def init_params(key, input_size, hidden_size, num_layers, output_size):
    """Deterministic init matching nn.LSTM / nn.Linear parameter shapes.

    PyTorch stores W_ih (4H, in), W_hh (4H, H), b_ih (4H,), b_hh (4H,) per
    layer and fc.weight (O, H), fc.bias (O,).  We pre-transpose the matmul
    weights and fold b_ih + b_hh into a single bias row.
    """
    H = hidden_size
    params = {}
    scale = 1.0 / jnp.sqrt(jnp.float32(H))
    for l in range(num_layers):
        in_dim = input_size if l == 0 else H
        key, k1, k2, k3, k4 = jax.random.split(key, 5)
        w_ih = jax.random.uniform(k1, (4 * H, in_dim), jnp.float32, -scale, scale)
        w_hh = jax.random.uniform(k2, (4 * H, H), jnp.float32, -scale, scale)
        b_ih = jax.random.uniform(k3, (4 * H,), jnp.float32, -scale, scale)
        b_hh = jax.random.uniform(k4, (4 * H,), jnp.float32, -scale, scale)
        params[f"w_ih_T_{l}"] = w_ih.T                      # (in_dim, 4H)
        params[f"w_hh_T_{l}"] = w_hh.T                      # (H, 4H)
        params[f"b_{l}"] = (b_ih + b_hh).reshape(1, 4 * H)  # (1, 4H)
    key, k5, k6 = jax.random.split(key, 3)
    fc_scale = 1.0 / jnp.sqrt(jnp.float32(H))
    w_fc = jax.random.uniform(k5, (output_size, H), jnp.float32, -fc_scale, fc_scale)
    b_fc = jax.random.uniform(k6, (output_size,), jnp.float32, -fc_scale, fc_scale)
    params["w_fc_T"] = w_fc.T                               # (H, O)
    params["b_fc"] = b_fc.reshape(1, output_size)           # (1, O)
    return params


def reference_forward(x, params, *, hidden_size, num_layers, output_size):
    """Pure-JAX reference with identical semantics (sanity check)."""
    B, T, _ = x.shape
    H = hidden_size
    layer_in = x
    h = jnp.zeros((B, H), jnp.float32)
    for l in range(num_layers):
        w_ih = params[f"w_ih_T_{l}"]
        w_hh = params[f"w_hh_T_{l}"]
        bias = params[f"b_{l}"]
        h = jnp.zeros((B, H), jnp.float32)
        c = jnp.zeros((B, H), jnp.float32)
        outs = []
        for t in range(T):
            gates = layer_in[:, t, :] @ w_ih + h @ w_hh + bias
            i_g = jax.nn.sigmoid(gates[:, 0 * H:1 * H])
            f_g = jax.nn.sigmoid(gates[:, 1 * H:2 * H])
            g_g = jnp.tanh(gates[:, 2 * H:3 * H])
            o_g = jax.nn.sigmoid(gates[:, 3 * H:4 * H])
            c = f_g * c + i_g * g_g
            h = o_g * jnp.tanh(c)
            outs.append(h)
        layer_in = jnp.stack(outs, axis=1)
    return h @ params["w_fc_T"] + params["b_fc"]


if __name__ == "__main__":
    # Small shapes consistent with SimpleLSTM(input_size, hidden_size,
    # num_layers, output_size) and a batch_first (B, T, I) input.
    B, T = 2, 8
    INPUT_SIZE, HIDDEN_SIZE, NUM_LAYERS, OUTPUT_SIZE = 4, 32, 2, 4

    key = jax.random.PRNGKey(0)
    key, xkey = jax.random.split(key)
    x = jax.random.normal(xkey, (B, T, INPUT_SIZE), jnp.float32)

    params = init_params(key, INPUT_SIZE, HIDDEN_SIZE, NUM_LAYERS, OUTPUT_SIZE)

    fwd = jax.jit(
        functools.partial(
            simple_lstm_forward,
            hidden_size=HIDDEN_SIZE,
            num_layers=NUM_LAYERS,
            output_size=OUTPUT_SIZE,
        )
    )
    out = jax.block_until_ready(fwd(x, params))

    ref = reference_forward(
        x, params,
        hidden_size=HIDDEN_SIZE, num_layers=NUM_LAYERS, output_size=OUTPUT_SIZE,
    )
    assert out.shape == (B, OUTPUT_SIZE)
    assert jnp.allclose(out, ref, atol=1e-4, rtol=1e-4)

    print("KERNEL_OK")
</pallas_src>

<mosaic_0001>
module attributes {stable_mosaic.version = 11 : i64} {
  func.func @kernel(%arg0: i32, %arg1: memref<8x8x4xf32, #tpu.memory_space<vmem>>, %arg2: memref<4x128xf32, #tpu.memory_space<vmem>>, %arg3: memref<32x128xf32, #tpu.memory_space<vmem>>, %arg4: memref<1x128xf32, #tpu.memory_space<vmem>>, %arg5: memref<32x128xf32, #tpu.memory_space<vmem>>, %arg6: memref<32x128xf32, #tpu.memory_space<vmem>>, %arg7: memref<1x128xf32, #tpu.memory_space<vmem>>, %arg8: memref<32x4xf32, #tpu.memory_space<vmem>>, %arg9: memref<1x4xf32, #tpu.memory_space<vmem>>, %arg10: memref<8x4xf32, #tpu.memory_space<vmem>>, %arg11: memref<8x8x32xf32, #tpu.memory_space<vmem>>, %arg12: memref<8x8x128xf32, #tpu.memory_space<vmem>>) attributes {dimension_semantics = [#tpu.dimension_semantics<parallel>], iteration_bounds = array<i64: 1>, scalar_prefetch = 0 : i64, scratch_operands = 2 : i64, tpu.core_type = #tpu.core_type<tc>, window_params = [{transform_indices = @transform_0, window_bounds = array<i64: 8, 8, 4>}, {pipeline_mode = #tpu.pipeline_mode<synchronous>, transform_indices = @transform_1, window_bounds = array<i64: 4, 128>}, {pipeline_mode = #tpu.pipeline_mode<synchronous>, transform_indices = @transform_2, window_bounds = array<i64: 32, 128>}, {pipeline_mode = #tpu.pipeline_mode<synchronous>, transform_indices = @transform_3, window_bounds = array<i64: 1, 128>}, {pipeline_mode = #tpu.pipeline_mode<synchronous>, transform_indices = @transform_4, window_bounds = array<i64: 32, 128>}, {pipeline_mode = #tpu.pipeline_mode<synchronous>, transform_indices = @transform_5, window_bounds = array<i64: 32, 128>}, {pipeline_mode = #tpu.pipeline_mode<synchronous>, transform_indices = @transform_6, window_bounds = array<i64: 1, 128>}, {pipeline_mode = #tpu.pipeline_mode<synchronous>, transform_indices = @transform_7, window_bounds = array<i64: 32, 4>}, {pipeline_mode = #tpu.pipeline_mode<synchronous>, transform_indices = @transform_8, window_bounds = array<i64: 1, 4>}, {transform_indices = @transform_9, window_bounds = array<i64: 8, 4>}]} {
    %c0 = arith.constant 0 : index
    %c0_0 = arith.constant 0 : index
    %0 = vector.load %arg2[%c0, %c0_0] : memref<4x128xf32, #tpu.memory_space<vmem>>, vector<4x128xf32>
    %c0_1 = arith.constant 0 : index
    %c0_2 = arith.constant 0 : index
    %1 = vector.load %arg3[%c0_1, %c0_2] : memref<32x128xf32, #tpu.memory_space<vmem>>, vector<32x128xf32>
    %c0_3 = arith.constant 0 : index
    %c0_4 = arith.constant 0 : index
    %2 = vector.load %arg4[%c0_3, %c0_4] : memref<1x128xf32, #tpu.memory_space<vmem>>, vector<1x128xf32>
    %cst = arith.constant 0.000000e+00 : f32
    %3 = vector.broadcast %cst : f32 to vector<8x32xf32>
    %cst_5 = arith.constant 0.000000e+00 : f32
    %4 = vector.broadcast %cst_5 : f32 to vector<8x32xf32>
    %c0_6 = arith.constant 0 : index
    %c0_7 = arith.constant 0 : index
    %c0_8 = arith.constant 0 : index
    %5 = vector.load %arg1[%c0_6, %c0_7, %c0_8] : memref<8x8x4xf32, #tpu.memory_space<vmem>>, vector<8x8x4xf32>
    %6 = vector.shape_cast %5 : vector<8x8x4xf32> to vector<64x4xf32>
    %cst_9 = arith.constant dense<0.000000e+00> : vector<64x128xf32>
    %7 = tpu.matmul %6, %0, %cst_9 {dimension_numbers = #tpu.dot_dimension_numbers<[1], [0], [0], [1], [0, 0, 1, 1], [], []>} : vector<64x4xf32>, vector<4x128xf32>, vector<64x128xf32> -> vector<64x128xf32>
    %8 = vector.broadcast %2 : vector<1x128xf32> to vector<64x128xf32>
    %9 = arith.addf %7, %8 : vector<64x128xf32>
    %10 = vector.shape_cast %9 : vector<64x128xf32> to vector<8x8x128xf32>
    %c0_10 = arith.constant 0 : index
    %c0_11 = arith.constant 0 : index
    %c0_12 = arith.constant 0 : index
    %11 = vector.load %arg12[%c0_10, %c0_11, %c0_12] : memref<8x8x128xf32, #tpu.memory_space<vmem>>, vector<8x8x128xf32>
    tpu.vector_store %arg12[%c0_10, %c0_11, %c0_12], %10 {strides = array<i32>} : memref<8x8x128xf32, #tpu.memory_space<vmem>>, vector<8x8x128xf32>,
    %c0_i32 = arith.constant 0 : i32
    %12 = arith.index_cast %c0_i32 : i32 to index
    %c0_13 = arith.constant 0 : index
    %c0_14 = arith.constant 0 : index
    %13 = vector.load %arg12[%12, %c0_13, %c0_14] : memref<8x8x128xf32, #tpu.memory_space<vmem>>, vector<1x8x128xf32>
    %14 = vector.shape_cast %13 : vector<1x8x128xf32> to vector<8x128xf32>
    %cst_15 = arith.constant dense<0.000000e+00> : vector<8x128xf32>
    %15 = tpu.matmul %3, %1, %cst_15 {dimension_numbers = #tpu.dot_dimension_numbers<[1], [0], [0], [1], [0, 0, 1, 1], [], []>} : vector<8x32xf32>, vector<32x128xf32>, vector<8x128xf32> -> vector<8x128xf32>
    %16 = arith.addf %14, %15 : vector<8x128xf32>
    %17 = arith.negf %16 : vector<8x128xf32>
    %18 = math.exp %17 : vector<8x128xf32>
    %cst_16 = arith.constant 1.000000e+00 : f32
    %19 = vector.broadcast %cst_16 : f32 to vector<8x128xf32>
    %20 = arith.addf %19, %18 : vector<8x128xf32>
    %21 = arith.divf %19, %20 : vector<8x128xf32>
    %22 = math.tanh %16 : vector<8x128xf32>
    %23 = vector.extract_strided_slice %21 {offsets = [0, 0], sizes = [8, 32], strides = [1, 1]} : vector<8x128xf32> to vector<8x32xf32>
    %24 = vector.extract_strided_slice %21 {offsets = [0, 32], sizes = [8, 32], strides = [1, 1]} : vector<8x128xf32> to vector<8x32xf32>
    %25 = vector.extract_strided_slice %22 {offsets = [0, 64], sizes = [8, 32], strides = [1, 1]} : vector<8x128xf32> to vector<8x32xf32>
    %26 = vector.extract_strided_slice %21 {offsets = [0, 96], sizes = [8, 32], strides = [1, 1]} : vector<8x128xf32> to vector<8x32xf32>
    %27 = arith.mulf %24, %4 : vector<8x32xf32>
    %28 = arith.mulf %23, %25 : vector<8x32xf32>
    %29 = arith.addf %27, %28 : vector<8x32xf32>
    %30 = math.tanh %29 : vector<8x32xf32>
    %31 = arith.mulf %26, %30 : vector<8x32xf32>
    %c0_i32_17 = arith.constant 0 : i32
    %32 = arith.addi %c0_i32_17, %c0_i32 : i32
    %33 = arith.index_cast %32 : i32 to index
    %c0_18 = arith.constant 0 : index
    %c0_19 = arith.constant 0 : index
    %34 = vector.load %arg11[%33, %c0_18, %c0_19] : memref<8x8x32xf32, #tpu.memory_space<vmem>>, vector<1x8x32xf32>
    %35 = vector.shape_cast %34 : vector<1x8x32xf32> to vector<8x32xf32>
    %36 = vector.shape_cast %31 : vector<8x32xf32> to vector<1x8x32xf32>
    tpu.vector_store %arg11[%33, %c0_18, %c0_19], %36 {strides = array<i32>} : memref<8x8x32xf32, #tpu.memory_space<vmem>>, vector<1x8x32xf32>,
    %c1_i32 = arith.constant 1 : i32
    %37 = arith.index_cast %c1_i32 : i32 to index
    %c0_20 = arith.constant 0 : index
    %c0_21 = arith.constant 0 : index
    %38 = vector.load %arg12[%37, %c0_20, %c0_21] : memref<8x8x128xf32, #tpu.memory_space<vmem>>, vector<1x8x128xf32>
    %39 = vector.shape_cast %38 : vector<1x8x128xf32> to vector<8x128xf32>
    %cst_22 = arith.constant dense<0.000000e+00> : vector<8x128xf32>
    %40 = tpu.matmul %31, %1, %cst_22 {dimension_numbers = #tpu.dot_dimension_numbers<[1], [0], [0], [1], [0, 0, 1, 1], [], []>} : vector<8x32xf32>, vector<32x128xf32>, vector<8x128xf32> -> vector<8x128xf32>
    %41 = arith.addf %39, %40 : vector<8x128xf32>
    %42 = arith.negf %41 : vector<8x128xf32>
    %43 = math.exp %42 : vector<8x128xf32>
    %cst_23 = arith.constant 1.000000e+00 : f32
    %44 = vector.broadcast %cst_23 : f32 to vector<8x128xf32>
    %45 = arith.addf %44, %43 : vector<8x128xf32>
    %46 = arith.divf %44, %45 : vector<8x128xf32>
    %47 = math.tanh %41 : vector<8x128xf32>
    %48 = vector.extract_strided_slice %46 {offsets = [0, 0], sizes = [8, 32], strides = [1, 1]} : vector<8x128xf32> to vector<8x32xf32>
    %49 = vector.extract_strided_slice %46 {offsets = [0, 32], sizes = [8, 32], strides = [1, 1]} : vector<8x128xf32> to vector<8x32xf32>
    %50 = vector.extract_strided_slice %47 {offsets = [0, 64], sizes = [8, 32], strides = [1, 1]} : vector<8x128xf32> to vector<8x32xf32>
    %51 = vector.extract_strided_slice %46 {offsets = [0, 96], sizes = [8, 32], strides = [1, 1]} : vector<8x128xf32> to vector<8x32xf32>
    %52 = arith.mulf %49, %29 : vector<8x32xf32>
    %53 = arith.mulf %48, %50 : vector<8x32xf32>
    %54 = arith.addf %52, %53 : vector<8x32xf32>
    %55 = math.tanh %54 : vector<8x32xf32>
    %56 = arith.mulf %51, %55 : vector<8x32xf32>
    %c0_i32_24 = arith.constant 0 : i32
    %57 = arith.addi %c0_i32_24, %c1_i32 : i32
    %58 = arith.index_cast %57 : i32 to index
    %c0_25 = arith.constant 0 : index
    %c0_26 = arith.constant 0 : index
    %59 = vector.load %arg11[%58, %c0_25, %c0_26] : memref<8x8x32xf32, #tpu.memory_space<vmem>>, vector<1x8x32xf32>
    %60 = vector.shape_cast %59 : vector<1x8x32xf32> to vector<8x32xf32>
    %61 = vector.shape_cast %56 : vector<8x32xf32> to vector<1x8x32xf32>
    tpu.vector_store %arg11[%58, %c0_25, %c0_26], %61 {strides = array<i32>} : memref<8x8x32xf32, #tpu.memory_space<vmem>>, vector<1x8x32xf32>,
    %c2_i32 = arith.constant 2 : i32
    %62 = arith.index_cast %c2_i32 : i32 to index
    %c0_27 = arith.constant 0 : index
    %c0_28 = arith.constant 0 : index
    %63 = vector.load %arg12[%62, %c0_27, %c0_28] : memref<8x8x128xf32, #tpu.memory_space<vmem>>, vector<1x8x128xf32>
    %64 = vector.shape_cast %63 : vector<1x8x128xf32> to vector<8x128xf32>
    %cst_29 = arith.constant dense<0.000000e+00> : vector<8x128xf32>
    %65 = tpu.matmul %56, %1, %cst_29 {dimension_numbers = #tpu.dot_dimension_numbers<[1], [0], [0], [1], [0, 0, 1, 1], [], []>} : vector<8x32xf32>, vector<32x128xf32>, vector<8x128xf32> -> vector<8x128xf32>
    %66 = arith.addf %64, %65 : vector<8x128xf32>
    %67 = arith.negf %66 : vector<8x128xf32>
    %68 = math.exp %67 : vector<8x128xf32>
    %cst_30 = arith.constant 1.000000e+00 : f32
    %69 = vector.broadcast %cst_30 : f32 to vector<8x128xf32>
    %70 = arith.addf %69, %68 : vector<8x128xf32>
    %71 = arith.divf %69, %70 : vector<8x128xf32>
    %72 = math.tanh %66 : vector<8x128xf32>
    %73 = vector.extract_strided_slice %71 {offsets = [0, 0], sizes = [8, 32], strides = [1, 1]} : vector<8x128xf32> to vector<8x32xf32>
    %74 = vector.extract_strided_slice %71 {offsets = [0, 32], sizes = [8, 32], strides = [1, 1]} : vector<8x128xf32> to vector<8x32xf32>
    %75 = vector.extract_strided_slice %72 {offsets = [0, 64], sizes = [8, 32], strides = [1, 1]} : vector<8x128xf32> to vector<8x32xf32>
    %76 = vector.extract_strided_slice %71 {offsets = [0, 96], sizes = [8, 32], strides = [1, 1]} : vector<8x128xf32> to vector<8x32xf32>
    %77 = arith.mulf %74, %54 : vector<8x32xf32>
    %78 = arith.mulf %73, %75 : vector<8x32xf32>
    %79 = arith.addf %77, %78 : vector<8x32xf32>
    %80 = math.tanh %79 : vector<8x32xf32>
    %81 = arith.mulf %76, %80 : vector<8x32xf32>
    %c0_i32_31 = arith.constant 0 : i32
    %82 = arith.addi %c0_i32_31, %c2_i32 : i32
    %83 = arith.index_cast %82 : i32 to index
    %c0_32 = arith.constant 0 : index
    %c0_33 = arith.constant 0 : index
    %84 = vector.load %arg11[%83, %c0_32, %c0_33] : memref<8x8x32xf32, #tpu.memory_space<vmem>>, vector<1x8x32xf32>
    %85 = vector.shape_cast %84 : vector<1x8x32xf32> to vector<8x32xf32>
    %86 = vector.shape_cast %81 : vector<8x32xf32> to vector<1x8x32xf32>
    tpu.vector_store %arg11[%83, %c0_32, %c0_33], %86 {strides = array<i32>} : memref<8x8x32xf32, #tpu.memory_space<vmem>>, vector<1x8x32xf32>,
    %c3_i32 = arith.constant 3 : i32
    %87 = arith.index_cast %c3_i32 : i32 to index
    %c0_34 = arith.constant 0 : index
    %c0_35 = arith.constant 0 : index
    %88 = vector.load %arg12[%87, %c0_34, %c0_35] : memref<8x8x128xf32, #tpu.memory_space<vmem>>, vector<1x8x128xf32>
    %89 = vector.shape_cast %88 : vector<1x8x128xf32> to vector<8x128xf32>
    %cst_36 = arith.constant dense<0.000000e+00> : vector<8x128xf32>
    %90 = tpu.matmul %81, %1, %cst_36 {dimension_numbers = #tpu.dot_dimension_numbers<[1], [0], [0], [1], [0, 0, 1, 1], [], []>} : vector<8x32xf32>, vector<32x128xf32>, vector<8x128xf32> -> vector<8x128xf32>
    %91 = arith.addf %89, %90 : vector<8x128xf32>
    %92 = arith.negf %91 : vector<8x128xf32>
    %93 = math.exp %92 : vector<8x128xf32>
    %cst_37 = arith.constant 1.000000e+00 : f32
    %94 = vector.broadcast %cst_37 : f32 to vector<8x128xf32>
    %95 = arith.addf %94, %93 : vector<8x128xf32>
    %96 = arith.divf %94, %95 : vector<8x128xf32>
    %97 = math.tanh %91 : vector<8x128xf32>
    %98 = vector.extract_strided_slice %96 {offsets = [0, 0], sizes = [8, 32], strides = [1, 1]} : vector<8x128xf32> to vector<8x32xf32>
    %99 = vector.extract_strided_slice %96 {offsets = [0, 32], sizes = [8, 32], strides = [1, 1]} : vector<8x128xf32> to vector<8x32xf32>
    %100 = vector.extract_strided_slice %97 {offsets = [0, 64], sizes = [8, 32], strides = [1, 1]} : vector<8x128xf32> to vector<8x32xf32>
    %101 = vector.extract_strided_slice %96 {offsets = [0, 96], sizes = [8, 32], strides = [1, 1]} : vector<8x128xf32> to vector<8x32xf32>
    %102 = arith.mulf %99, %79 : vector<8x32xf32>
    %103 = arith.mulf %98, %100 : vector<8x32xf32>
    %104 = arith.addf %102, %103 : vector<8x32xf32>
    %105 = math.tanh %104 : vector<8x32xf32>
    %106 = arith.mulf %101, %105 : vector<8x32xf32>
    %c0_i32_38 = arith.constant 0 : i32
    %107 = arith.addi %c0_i32_38, %c3_i32 : i32
    %108 = arith.index_cast %107 : i32 to index
    %c0_39 = arith.constant 0 : index
    %c0_40 = arith.constant 0 : index
    %109 = vector.load %arg11[%108, %c0_39, %c0_40] : memref<8x8x32xf32, #tpu.memory_space<vmem>>, vector<1x8x32xf32>
    %110 = vector.shape_cast %109 : vector<1x8x32xf32> to vector<8x32xf32>
    %111 = vector.shape_cast %106 : vector<8x32xf32> to vector<1x8x32xf32>
    tpu.vector_store %arg11[%108, %c0_39, %c0_40], %111 {strides = array<i32>} : memref<8x8x32xf32, #tpu.memory_space<vmem>>, vector<1x8x32xf32>,
    %c4_i32 = arith.constant 4 : i32
    %112 = arith.index_cast %c4_i32 : i32 to index
    %c0_41 = arith.constant 0 : index
    %c0_42 = arith.constant 0 : index
    %113 = vector.load %arg12[%112, %c0_41, %c0_42] : memref<8x8x128xf32, #tpu.memory_space<vmem>>, vector<1x8x128xf32>
    %114 = vector.shape_cast %113 : vector<1x8x128xf32> to vector<8x128xf32>
    %cst_43 = arith.constant dense<0.000000e+00> : vector<8x128xf32>
    %115 = tpu.matmul %106, %1, %cst_43 {dimension_numbers = #tpu.dot_dimension_numbers<[1], [0], [0], [1], [0, 0, 1, 1], [], []>} : vector<8x32xf32>, vector<32x128xf32>, vector<8x128xf32> -> vector<8x128xf32>
    %116 = arith.addf %114, %115 : vector<8x128xf32>
    %117 = arith.negf %116 : vector<8x128xf32>
    %118 = math.exp %117 : vector<8x128xf32>
    %cst_44 = arith.constant 1.000000e+00 : f32
    %119 = vector.broadcast %cst_44 : f32 to vector<8x128xf32>
    %120 = arith.addf %119, %118 : vector<8x128xf32>
    %121 = arith.divf %119, %120 : vector<8x128xf32>
    %122 = math.tanh %116 : vector<8x128xf32>
    %123 = vector.extract_strided_slice %121 {offsets = [0, 0], sizes = [8, 32], strides = [1, 1]} : vector<8x128xf32> to vector<8x32xf32>
    %124 = vector.extract_strided_slice %121 {offsets = [0, 32], sizes = [8, 32], strides = [1, 1]} : vector<8x128xf32> to vector<8x32xf32>
    %125 = vector.extract_strided_slice %122 {offsets = [0, 64], sizes = [8, 32], strides = [1, 1]} : vector<8x128xf32> to vector<8x32xf32>
    %126 = vector.extract_strided_slice %121 {offsets = [0, 96], sizes = [8, 32], strides = [1, 1]} : vector<8x128xf32> to vector<8x32xf32>
    %127 = arith.mulf %124, %104 : vector<8x32xf32>
    %128 = arith.mulf %123, %125 : vector<8x32xf32>
    %129 = arith.addf %127, %128 : vector<8x32xf32>
    %130 = math.tanh %129 : vector<8x32xf32>
    %131 = arith.mulf %126, %130 : vector<8x32xf32>
    %c0_i32_45 = arith.constant 0 : i32
    %132 = arith.addi %c0_i32_45, %c4_i32 : i32
    %133 = arith.index_cast %132 : i32 to index
    %c0_46 = arith.constant 0 : index
    %c0_47 = arith.constant 0 : index
    %134 = vector.load %arg11[%133, %c0_46, %c0_47] : memref<8x8x32xf32, #tpu.memory_space<vmem>>, vector<1x8x32xf32>
    %135 = vector.shape_cast %134 : vector<1x8x32xf32> to vector<8x32xf32>
    %136 = vector.shape_cast %131 : vector<8x32xf32> to vector<1x8x32xf32>
    tpu.vector_store %arg11[%133, %c0_46, %c0_47], %136 {strides = array<i32>} : memref<8x8x32xf32, #tpu.memory_space<vmem>>, vector<1x8x32xf32>,
    %c5_i32 = arith.constant 5 : i32
    %137 = arith.index_cast %c5_i32 : i32 to index
    %c0_48 = arith.constant 0 : index
    %c0_49 = arith.constant 0 : index
    %138 = vector.load %arg12[%137, %c0_48, %c0_49] : memref<8x8x128xf32, #tpu.memory_space<vmem>>, vector<1x8x128xf32>
    %139 = vector.shape_cast %138 : vector<1x8x128xf32> to vector<8x128xf32>
    %cst_50 = arith.constant dense<0.000000e+00> : vector<8x128xf32>
    %140 = tpu.matmul %131, %1, %cst_50 {dimension_numbers = #tpu.dot_dimension_numbers<[1], [0], [0], [1], [0, 0, 1, 1], [], []>} : vector<8x32xf32>, vector<32x128xf32>, vector<8x128xf32> -> vector<8x128xf32>
    %141 = arith.addf %139, %140 : vector<8x128xf32>
    %142 = arith.negf %141 : vector<8x128xf32>
    %143 = math.exp %142 : vector<8x128xf32>
    %cst_51 = arith.constant 1.000000e+00 : f32
    %144 = vector.broadcast %cst_51 : f32 to vector<8x128xf32>
    %145 = arith.addf %144, %143 : vector<8x128xf32>
    %146 = arith.divf %144, %145 : vector<8x128xf32>
    %147 = math.tanh %141 : vector<8x128xf32>
    %148 = vector.extract_strided_slice %146 {offsets = [0, 0], sizes = [8, 32], strides = [1, 1]} : vector<8x128xf32> to vector<8x32xf32>
    %149 = vector.extract_strided_slice %146 {offsets = [0, 32], sizes = [8, 32], strides = [1, 1]} : vector<8x128xf32> to vector<8x32xf32>
    %150 = vector.extract_strided_slice %147 {offsets = [0, 64], sizes = [8, 32], strides = [1, 1]} : vector<8x128xf32> to vector<8x32xf32>
    %151 = vector.extract_strided_slice %146 {offsets = [0, 96], sizes = [8, 32], strides = [1, 1]} : vector<8x128xf32> to vector<8x32xf32>
    %152 = arith.mulf %149, %129 : vector<8x32xf32>
    %153 = arith.mulf %148, %150 : vector<8x32xf32>
    %154 = arith.addf %152, %153 : vector<8x32xf32>
    %155 = math.tanh %154 : vector<8x32xf32>
    %156 = arith.mulf %151, %155 : vector<8x32xf32>
    %c0_i32_52 = arith.constant 0 : i32
    %157 = arith.addi %c0_i32_52, %c5_i32 : i32
    %158 = arith.index_cast %157 : i32 to index
    %c0_53 = arith.constant 0 : index
    %c0_54 = arith.constant 0 : index
    %159 = vector.load %arg11[%158, %c0_53, %c0_54] : memref<8x8x32xf32, #tpu.memory_space<vmem>>, vector<1x8x32xf32>
    %160 = vector.shape_cast %159 : vector<1x8x32xf32> to vector<8x32xf32>
    %161 = vector.shape_cast %156 : vector<8x32xf32> to vector<1x8x32xf32>
    tpu.vector_store %arg11[%158, %c0_53, %c0_54], %161 {strides = array<i32>} : memref<8x8x32xf32, #tpu.memory_space<vmem>>, vector<1x8x32xf32>,
    %c6_i32 = arith.constant 6 : i32
    %162 = arith.index_cast %c6_i32 : i32 to index
    %c0_55 = arith.constant 0 : index
    %c0_56 = arith.constant 0 : index
    %163 = vector.load %arg12[%162, %c0_55, %c0_56] : memref<8x8x128xf32, #tpu.memory_space<vmem>>, vector<1x8x128xf32>
    %164 = vector.shape_cast %163 : vector<1x8x128xf32> to vector<8x128xf32>
    %cst_57 = arith.constant dense<0.000000e+00> : vector<8x128xf32>
    %165 = tpu.matmul %156, %1, %cst_57 {dimension_numbers = #tpu.dot_dimension_numbers<[1], [0], [0], [1], [0, 0, 1, 1], [], []>} : vector<8x32xf32>, vector<32x128xf32>, vector<8x128xf32> -> vector<8x128xf32>
    %166 = arith.addf %164, %165 : vector<8x128xf32>
    %167 = arith.negf %166 : vector<8x128xf32>
    %168 = math.exp %167 : vector<8x128xf32>
    %cst_58 = arith.constant 1.000000e+00 : f32
    %169 = vector.broadcast %cst_58 : f32 to vector<8x128xf32>
    %170 = arith.addf %169, %168 : vector<8x128xf32>
    %171 = arith.divf %169, %170 : vector<8x128xf32>
    %172 = math.tanh %166 : vector<8x128xf32>
    %173 = vector.extract_strided_slice %171 {offsets = [0, 0], sizes = [8, 32], strides = [1, 1]} : vector<8x128xf32> to vector<8x32xf32>
    %174 = vector.extract_strided_slice %171 {offsets = [0, 32], sizes = [8, 32], strides = [1, 1]} : vector<8x128xf32> to vector<8x32xf32>
    %175 = vector.extract_strided_slice %172 {offsets = [0, 64], sizes = [8, 32], strides = [1, 1]} : vector<8x128xf32> to vector<8x32xf32>
    %176 = vector.extract_strided_slice %171 {offsets = [0, 96], sizes = [8, 32], strides = [1, 1]} : vector<8x128xf32> to vector<8x32xf32>
    %177 = arith.mulf %174, %154 : vector<8x32xf32>
    %178 = arith.mulf %173, %175 : vector<8x32xf32>
    %179 = arith.addf %177, %178 : vector<8x32xf32>
    %180 = math.tanh %179 : vector<8x32xf32>
    %181 = arith.mulf %176, %180 : vector<8x32xf32>
    %c0_i32_59 = arith.constant 0 : i32
    %182 = arith.addi %c0_i32_59, %c6_i32 : i32
    %183 = arith.index_cast %182 : i32 to index
    %c0_60 = arith.constant 0 : index
    %c0_61 = arith.constant 0 : index
    %184 = vector.load %arg11[%183, %c0_60, %c0_61] : memref<8x8x32xf32, #tpu.memory_space<vmem>>, vector<1x8x32xf32>
    %185 = vector.shape_cast %184 : vector<1x8x32xf32> to vector<8x32xf32>
    %186 = vector.shape_cast %181 : vector<8x32xf32> to vector<1x8x32xf32>
    tpu.vector_store %arg11[%183, %c0_60, %c0_61], %186 {strides = array<i32>} : memref<8x8x32xf32, #tpu.memory_space<vmem>>, vector<1x8x32xf32>,
    %c7_i32 = arith.constant 7 : i32
    %187 = arith.index_cast %c7_i32 : i32 to index
    %c0_62 = arith.constant 0 : index
    %c0_63 = arith.constant 0 : index
    %188 = vector.load %arg12[%187, %c0_62, %c0_63] : memref<8x8x128xf32, #tpu.memory_space<vmem>>, vector<1x8x128xf32>
    %189 = vector.shape_cast %188 : vector<1x8x128xf32> to vector<8x128xf32>
    %cst_64 = arith.constant dense<0.000000e+00> : vector<8x128xf32>
    %190 = tpu.matmul %181, %1, %cst_64 {dimension_numbers = #tpu.dot_dimension_numbers<[1], [0], [0], [1], [0, 0, 1, 1], [], []>} : vector<8x32xf32>, vector<32x128xf32>, vector<8x128xf32> -> vector<8x128xf32>
    %191 = arith.addf %189, %190 : vector<8x128xf32>
    %192 = arith.negf %191 : vector<8x128xf32>
    %193 = math.exp %192 : vector<8x128xf32>
    %cst_65 = arith.constant 1.000000e+00 : f32
    %194 = vector.broadcast %cst_65 : f32 to vector<8x128xf32>
    %195 = arith.addf %194, %193 : vector<8x128xf32>
    %196 = arith.divf %194, %195 : vector<8x128xf32>
    %197 = math.tanh %191 : vector<8x128xf32>
    %198 = vector.extract_strided_slice %196 {offsets = [0, 0], sizes = [8, 32], strides = [1, 1]} : vector<8x128xf32> to vector<8x32xf32>
    %199 = vector.extract_strided_slice %196 {offsets = [0, 32], sizes = [8, 32], strides = [1, 1]} : vector<8x128xf32> to vector<8x32xf32>
    %200 = vector.extract_strided_slice %197 {offsets = [0, 64], sizes = [8, 32], strides = [1, 1]} : vector<8x128xf32> to vector<8x32xf32>
    %201 = vector.extract_strided_slice %196 {offsets = [0, 96], sizes = [8, 32], strides = [1, 1]} : vector<8x128xf32> to vector<8x32xf32>
    %202 = arith.mulf %199, %179 : vector<8x32xf32>
    %203 = arith.mulf %198, %200 : vector<8x32xf32>
    %204 = arith.addf %202, %203 : vector<8x32xf32>
    %205 = math.tanh %204 : vector<8x32xf32>
    %206 = arith.mulf %201, %205 : vector<8x32xf32>
    %c0_i32_66 = arith.constant 0 : i32
    %207 = arith.addi %c0_i32_66, %c7_i32 : i32
    %208 = arith.index_cast %207 : i32 to index
    %c0_67 = arith.constant 0 : index
    %c0_68 = arith.constant 0 : index
    %209 = vector.load %arg11[%208, %c0_67, %c0_68] : memref<8x8x32xf32, #tpu.memory_space<vmem>>, vector<1x8x32xf32>
    %210 = vector.shape_cast %209 : vector<1x8x32xf32> to vector<8x32xf32>
    %211 = vector.shape_cast %206 : vector<8x32xf32> to vector<1x8x32xf32>
    tpu.vector_store %arg11[%208, %c0_67, %c0_68], %211 {strides = array<i32>} : memref<8x8x32xf32, #tpu.memory_space<vmem>>, vector<1x8x32xf32>,
    %c8_i32 = arith.constant 8 : i32
    %c0_69 = arith.constant 0 : index
    %c0_70 = arith.constant 0 : index
    %212 = vector.load %arg5[%c0_69, %c0_70] : memref<32x128xf32, #tpu.memory_space<vmem>>, vector<32x128xf32>
    %c0_71 = arith.constant 0 : index
    %c0_72 = arith.constant 0 : index
    %213 = vector.load %arg6[%c0_71, %c0_72] : memref<32x128xf32, #tpu.memory_space<vmem>>, vector<32x128xf32>
    %c0_73 = arith.constant 0 : index
    %c0_74 = arith.constant 0 : index
    %214 = vector.load %arg7[%c0_73, %c0_74] : memref<1x128xf32, #tpu.memory_space<vmem>>, vector<1x128xf32>
    %cst_75 = arith.constant 0.000000e+00 : f32
    %215 = vector.broadcast %cst_75 : f32 to vector<8x32xf32>
    %cst_76 = arith.constant 0.000000e+00 : f32
    %216 = vector.broadcast %cst_76 : f32 to vector<8x32xf32>
    %c0_77 = arith.constant 0 : index
    %c0_78 = arith.constant 0 : index
    %c0_79 = arith.constant 0 : index
    %217 = vector.load %arg11[%c0_77, %c0_78, %c0_79] : memref<8x8x32xf32, #tpu.memory_space<vmem>>, vector<8x8x32xf32>
    %218 = vector.shape_cast %217 : vector<8x8x32xf32> to vector<64x32xf32>
    %cst_80 = arith.constant dense<0.000000e+00> : vector<64x128xf32>
    %219 = tpu.matmul %218, %212, %cst_80 {dimension_numbers = #tpu.dot_dimension_numbers<[1], [0], [0], [1], [0, 0, 1, 1], [], []>} : vector<64x32xf32>, vector<32x128xf32>, vector<64x128xf32> -> vector<64x128xf32>
    %220 = vector.broadcast %214 : vector<1x128xf32> to vector<64x128xf32>
    %221 = arith.addf %219, %220 : vector<64x128xf32>
    %222 = vector.shape_cast %221 : vector<64x128xf32> to vector<8x8x128xf32>
    %c0_81 = arith.constant 0 : index
    %c0_82 = arith.constant 0 : index
    %c0_83 = arith.constant 0 : index
    %223 = vector.load %arg12[%c0_81, %c0_82, %c0_83] : memref<8x8x128xf32, #tpu.memory_space<vmem>>, vector<8x8x128xf32>
    tpu.vector_store %arg12[%c0_81, %c0_82, %c0_83], %222 {strides = array<i32>} : memref<8x8x128xf32, #tpu.memory_space<vmem>>, vector<8x8x128xf32>,
    %c0_i32_84 = arith.constant 0 : i32
    %224 = arith.index_cast %c0_i32_84 : i32 to index
    %c0_85 = arith.constant 0 : index
    %c0_86 = arith.constant 0 : index
    %225 = vector.load %arg12[%224, %c0_85, %c0_86] : memref<8x8x128xf32, #tpu.memory_space<vmem>>, vector<1x8x128xf32>
    %226 = vector.shape_cast %225 : vector<1x8x128xf32> to vector<8x128xf32>
    %cst_87 = arith.constant dense<0.000000e+00> : vector<8x128xf32>
    %227 = tpu.matmul %215, %213, %cst_87 {dimension_numbers = #tpu.dot_dimension_numbers<[1], [0], [0], [1], [0, 0, 1, 1], [], []>} : vector<8x32xf32>, vector<32x128xf32>, vector<8x128xf32> -> vector<8x128xf32>
    %228 = arith.addf %226, %227 : vector<8x128xf32>
    %229 = arith.negf %228 : vector<8x128xf32>
    %230 = math.exp %229 : vector<8x128xf32>
    %cst_88 = arith.constant 1.000000e+00 : f32
    %231 = vector.broadcast %cst_88 : f32 to vector<8x128xf32>
    %232 = arith.addf %231, %230 : vector<8x128xf32>
    %233 = arith.divf %231, %232 : vector<8x128xf32>
    %234 = math.tanh %228 : vector<8x128xf32>
    %235 = vector.extract_strided_slice %233 {offsets = [0, 0], sizes = [8, 32], strides = [1, 1]} : vector<8x128xf32> to vector<8x32xf32>
    %236 = vector.extract_strided_slice %233 {offsets = [0, 32], sizes = [8, 32], strides = [1, 1]} : vector<8x128xf32> to vector<8x32xf32>
    %237 = vector.extract_strided_slice %234 {offsets = [0, 64], sizes = [8, 32], strides = [1, 1]} : vector<8x128xf32> to vector<8x32xf32>
    %238 = vector.extract_strided_slice %233 {offsets = [0, 96], sizes = [8, 32], strides = [1, 1]} : vector<8x128xf32> to vector<8x32xf32>
    %239 = arith.mulf %236, %216 : vector<8x32xf32>
    %240 = arith.mulf %235, %237 : vector<8x32xf32>
    %241 = arith.addf %239, %240 : vector<8x32xf32>
    %242 = math.tanh %241 : vector<8x32xf32>
    %243 = arith.mulf %238, %242 : vector<8x32xf32>
    %c1_i32_89 = arith.constant 1 : i32
    %244 = arith.index_cast %c1_i32_89 : i32 to index
    %c0_90 = arith.constant 0 : index
    %c0_91 = arith.constant 0 : index
    %245 = vector.load %arg12[%244, %c0_90, %c0_91] : memref<8x8x128xf32, #tpu.memory_space<vmem>>, vector<1x8x128xf32>
    %246 = vector.shape_cast %245 : vector<1x8x128xf32> to vector<8x128xf32>
    %cst_92 = arith.constant dense<0.000000e+00> : vector<8x128xf32>
    %247 = tpu.matmul %243, %213, %cst_92 {dimension_numbers = #tpu.dot_dimension_numbers<[1], [0], [0], [1], [0, 0, 1, 1], [], []>} : vector<8x32xf32>, vector<32x128xf32>, vector<8x128xf32> -> vector<8x128xf32>
    %248 = arith.addf %246, %247 : vector<8x128xf32>
    %249 = arith.negf %248 : vector<8x128xf32>
    %250 = math.exp %249 : vector<8x128xf32>
    %cst_93 = arith.constant 1.000000e+00 : f32
    %251 = vector.broadcast %cst_93 : f32 to vector<8x128xf32>
    %252 = arith.addf %251, %250 : vector<8x128xf32>
    %253 = arith.divf %251, %252 : vector<8x128xf32>
    %254 = math.tanh %248 : vector<8x128xf32>
    %255 = vector.extract_strided_slice %253 {offsets = [0, 0], sizes = [8, 32], strides = [1, 1]} : vector<8x128xf32> to vector<8x32xf32>
    %256 = vector.extract_strided_slice %253 {offsets = [0, 32], sizes = [8, 32], strides = [1, 1]} : vector<8x128xf32> to vector<8x32xf32>
    %257 = vector.extract_strided_slice %254 {offsets = [0, 64], sizes = [8, 32], strides = [1, 1]} : vector<8x128xf32> to vector<8x32xf32>
    %258 = vector.extract_strided_slice %253 {offsets = [0, 96], sizes = [8, 32], strides = [1, 1]} : vector<8x128xf32> to vector<8x32xf32>
    %259 = arith.mulf %256, %241 : vector<8x32xf32>
    %260 = arith.mulf %255, %257 : vector<8x32xf32>
    %261 = arith.addf %259, %260 : vector<8x32xf32>
    %262 = math.tanh %261 : vector<8x32xf32>
    %263 = arith.mulf %258, %262 : vector<8x32xf32>
    %c2_i32_94 = arith.constant 2 : i32
    %264 = arith.index_cast %c2_i32_94 : i32 to index
    %c0_95 = arith.constant 0 : index
    %c0_96 = arith.constant 0 : index
    %265 = vector.load %arg12[%264, %c0_95, %c0_96] : memref<8x8x128xf32, #tpu.memory_space<vmem>>, vector<1x8x128xf32>
    %266 = vector.shape_cast %265 : vector<1x8x128xf32> to vector<8x128xf32>
    %cst_97 = arith.constant dense<0.000000e+00> : vector<8x128xf32>
    %267 = tpu.matmul %263, %213, %cst_97 {dimension_numbers = #tpu.dot_dimension_numbers<[1], [0], [0], [1], [0, 0, 1, 1], [], []>} : vector<8x32xf32>, vector<32x128xf32>, vector<8x128xf32> -> vector<8x128xf32>
    %268 = arith.addf %266, %267 : vector<8x128xf32>
    %269 = arith.negf %268 : vector<8x128xf32>
    %270 = math.exp %269 : vector<8x128xf32>
    %cst_98 = arith.constant 1.000000e+00 : f32
    %271 = vector.broadcast %cst_98 : f32 to vector<8x128xf32>
    %272 = arith.addf %271, %270 : vector<8x128xf32>
    %273 = arith.divf %271, %272 : vector<8x128xf32>
    %274 = math.tanh %268 : vector<8x128xf32>
    %275 = vector.extract_strided_slice %273 {offsets = [0, 0], sizes = [8, 32], strides = [1, 1]} : vector<8x128xf32> to vector<8x32xf32>
    %276 = vector.extract_strided_slice %273 {offsets = [0, 32], sizes = [8, 32], strides = [1, 1]} : vector<8x128xf32> to vector<8x32xf32>
    %277 = vector.extract_strided_slice %274 {offsets = [0, 64], sizes = [8, 32], strides = [1, 1]} : vector<8x128xf32> to vector<8x32xf32>
    %278 = vector.extract_strided_slice %273 {offsets = [0, 96], sizes = [8, 32], strides = [1, 1]} : vector<8x128xf32> to vector<8x32xf32>
    %279 = arith.mulf %276, %261 : vector<8x32xf32>
    %280 = arith.mulf %275, %277 : vector<8x32xf32>
    %281 = arith.addf %279, %280 : vector<8x32xf32>
    %282 = math.tanh %281 : vector<8x32xf32>
    %283 = arith.mulf %278, %282 : vector<8x32xf32>
    %c3_i32_99 = arith.constant 3 : i32
    %284 = arith.index_cast %c3_i32_99 : i32 to index
    %c0_100 = arith.constant 0 : index
    %c0_101 = arith.constant 0 : index
    %285 = vector.load %arg12[%284, %c0_100, %c0_101] : memref<8x8x128xf32, #tpu.memory_space<vmem>>, vector<1x8x128xf32>
    %286 = vector.shape_cast %285 : vector<1x8x128xf32> to vector<8x128xf32>
    %cst_102 = arith.constant dense<0.000000e+00> : vector<8x128xf32>
    %287 = tpu.matmul %283, %213, %cst_102 {dimension_numbers = #tpu.dot_dimension_numbers<[1], [0], [0], [1], [0, 0, 1, 1], [], []>} : vector<8x32xf32>, vector<32x128xf32>, vector<8x128xf32> -> vector<8x128xf32>
    %288 = arith.addf %286, %287 : vector<8x128xf32>
    %289 = arith.negf %288 : vector<8x128xf32>
    %290 = math.exp %289 : vector<8x128xf32>
    %cst_103 = arith.constant 1.000000e+00 : f32
    %291 = vector.broadcast %cst_103 : f32 to vector<8x128xf32>
    %292 = arith.addf %291, %290 : vector<8x128xf32>
    %293 = arith.divf %291, %292 : vector<8x128xf32>
    %294 = math.tanh %288 : vector<8x128xf32>
    %295 = vector.extract_strided_slice %293 {offsets = [0, 0], sizes = [8, 32], strides = [1, 1]} : vector<8x128xf32> to vector<8x32xf32>
    %296 = vector.extract_strided_slice %293 {offsets = [0, 32], sizes = [8, 32], strides = [1, 1]} : vector<8x128xf32> to vector<8x32xf32>
    %297 = vector.extract_strided_slice %294 {offsets = [0, 64], sizes = [8, 32], strides = [1, 1]} : vector<8x128xf32> to vector<8x32xf32>
    %298 = vector.extract_strided_slice %293 {offsets = [0, 96], sizes = [8, 32], strides = [1, 1]} : vector<8x128xf32> to vector<8x32xf32>
    %299 = arith.mulf %296, %281 : vector<8x32xf32>
    %300 = arith.mulf %295, %297 : vector<8x32xf32>
    %301 = arith.addf %299, %300 : vector<8x32xf32>
    %302 = math.tanh %301 : vector<8x32xf32>
    %303 = arith.mulf %298, %302 : vector<8x32xf32>
    %c4_i32_104 = arith.constant 4 : i32
    %304 = arith.index_cast %c4_i32_104 : i32 to index
    %c0_105 = arith.constant 0 : index
    %c0_106 = arith.constant 0 : index
    %305 = vector.load %arg12[%304, %c0_105, %c0_106] : memref<8x8x128xf32, #tpu.memory_space<vmem>>, vector<1x8x128xf32>
    %306 = vector.shape_cast %305 : vector<1x8x128xf32> to vector<8x128xf32>
    %cst_107 = arith.constant dense<0.000000e+00> : vector<8x128xf32>
    %307 = tpu.matmul %303, %213, %cst_107 {dimension_numbers = #tpu.dot_dimension_numbers<[1], [0], [0], [1], [0, 0, 1, 1], [], []>} : vector<8x32xf32>, vector<32x128xf32>, vector<8x128xf32> -> vector<8x128xf32>
    %308 = arith.addf %306, %307 : vector<8x128xf32>
    %309 = arith.negf %308 : vector<8x128xf32>
    %310 = math.exp %309 : vector<8x128xf32>
    %cst_108 = arith.constant 1.000000e+00 : f32
    %311 = vector.broadcast %cst_108 : f32 to vector<8x128xf32>
    %312 = arith.addf %311, %310 : vector<8x128xf32>
    %313 = arith.divf %311, %312 : vector<8x128xf32>
    %314 = math.tanh %308 : vector<8x128xf32>
    %315 = vector.extract_strided_slice %313 {offsets = [0, 0], sizes = [8, 32], strides = [1, 1]} : vector<8x128xf32> to vector<8x32xf32>
    %316 = vector.extract_strided_slice %313 {offsets = [0, 32], sizes = [8, 32], strides = [1, 1]} : vector<8x128xf32> to vector<8x32xf32>
    %317 = vector.extract_strided_slice %314 {offsets = [0, 64], sizes = [8, 32], strides = [1, 1]} : vector<8x128xf32> to vector<8x32xf32>
    %318 = vector.extract_strided_slice %313 {offsets = [0, 96], sizes = [8, 32], strides = [1, 1]} : vector<8x128xf32> to vector<8x32xf32>
    %319 = arith.mulf %316, %301 : vector<8x32xf32>
    %320 = arith.mulf %315, %317 : vector<8x32xf32>
    %321 = arith.addf %319, %320 : vector<8x32xf32>
    %322 = math.tanh %321 : vector<8x32xf32>
    %323 = arith.mulf %318, %322 : vector<8x32xf32>
    %c5_i32_109 = arith.constant 5 : i32
    %324 = arith.index_cast %c5_i32_109 : i32 to index
    %c0_110 = arith.constant 0 : index
    %c0_111 = arith.constant 0 : index
    %325 = vector.load %arg12[%324, %c0_110, %c0_111] : memref<8x8x128xf32, #tpu.memory_space<vmem>>, vector<1x8x128xf32>
    %326 = vector.shape_cast %325 : vector<1x8x128xf32> to vector<8x128xf32>
    %cst_112 = arith.constant dense<0.000000e+00> : vector<8x128xf32>
    %327 = tpu.matmul %323, %213, %cst_112 {dimension_numbers = #tpu.dot_dimension_numbers<[1], [0], [0], [1], [0, 0, 1, 1], [], []>} : vector<8x32xf32>, vector<32x128xf32>, vector<8x128xf32> -> vector<8x128xf32>
    %328 = arith.addf %326, %327 : vector<8x128xf32>
    %329 = arith.negf %328 : vector<8x128xf32>
    %330 = math.exp %329 : vector<8x128xf32>
    %cst_113 = arith.constant 1.000000e+00 : f32
    %331 = vector.broadcast %cst_113 : f32 to vector<8x128xf32>
    %332 = arith.addf %331, %330 : vector<8x128xf32>
    %333 = arith.divf %331, %332 : vector<8x128xf32>
    %334 = math.tanh %328 : vector<8x128xf32>
    %335 = vector.extract_strided_slice %333 {offsets = [0, 0], sizes = [8, 32], strides = [1, 1]} : vector<8x128xf32> to vector<8x32xf32>
    %336 = vector.extract_strided_slice %333 {offsets = [0, 32], sizes = [8, 32], strides = [1, 1]} : vector<8x128xf32> to vector<8x32xf32>
    %337 = vector.extract_strided_slice %334 {offsets = [0, 64], sizes = [8, 32], strides = [1, 1]} : vector<8x128xf32> to vector<8x32xf32>
    %338 = vector.extract_strided_slice %333 {offsets = [0, 96], sizes = [8, 32], strides = [1, 1]} : vector<8x128xf32> to vector<8x32xf32>
    %339 = arith.mulf %336, %321 : vector<8x32xf32>
    %340 = arith.mulf %335, %337 : vector<8x32xf32>
    %341 = arith.addf %339, %340 : vector<8x32xf32>
    %342 = math.tanh %341 : vector<8x32xf32>
    %343 = arith.mulf %338, %342 : vector<8x32xf32>
    %c6_i32_114 = arith.constant 6 : i32
    %344 = arith.index_cast %c6_i32_114 : i32 to index
    %c0_115 = arith.constant 0 : index
    %c0_116 = arith.constant 0 : index
    %345 = vector.load %arg12[%344, %c0_115, %c0_116] : memref<8x8x128xf32, #tpu.memory_space<vmem>>, vector<1x8x128xf32>
    %346 = vector.shape_cast %345 : vector<1x8x128xf32> to vector<8x128xf32>
    %cst_117 = arith.constant dense<0.000000e+00> : vector<8x128xf32>
    %347 = tpu.matmul %343, %213, %cst_117 {dimension_numbers = #tpu.dot_dimension_numbers<[1], [0], [0], [1], [0, 0, 1, 1], [], []>} : vector<8x32xf32>, vector<32x128xf32>, vector<8x128xf32> -> vector<8x128xf32>
    %348 = arith.addf %346, %347 : vector<8x128xf32>
    %349 = arith.negf %348 : vector<8x128xf32>
    %350 = math.exp %349 : vector<8x128xf32>
    %cst_118 = arith.constant 1.000000e+00 : f32
    %351 = vector.broadcast %cst_118 : f32 to vector<8x128xf32>
    %352 = arith.addf %351, %350 : vector<8x128xf32>
    %353 = arith.divf %351, %352 : vector<8x128xf32>
    %354 = math.tanh %348 : vector<8x128xf32>
    %355 = vector.extract_strided_slice %353 {offsets = [0, 0], sizes = [8, 32], strides = [1, 1]} : vector<8x128xf32> to vector<8x32xf32>
    %356 = vector.extract_strided_slice %353 {offsets = [0, 32], sizes = [8, 32], strides = [1, 1]} : vector<8x128xf32> to vector<8x32xf32>
    %357 = vector.extract_strided_slice %354 {offsets = [0, 64], sizes = [8, 32], strides = [1, 1]} : vector<8x128xf32> to vector<8x32xf32>
    %358 = vector.extract_strided_slice %353 {offsets = [0, 96], sizes = [8, 32], strides = [1, 1]} : vector<8x128xf32> to vector<8x32xf32>
    %359 = arith.mulf %356, %341 : vector<8x32xf32>
    %360 = arith.mulf %355, %357 : vector<8x32xf32>
    %361 = arith.addf %359, %360 : vector<8x32xf32>
    %362 = math.tanh %361 : vector<8x32xf32>
    %363 = arith.mulf %358, %362 : vector<8x32xf32>
    %c7_i32_119 = arith.constant 7 : i32
    %364 = arith.index_cast %c7_i32_119 : i32 to index
    %c0_120 = arith.constant 0 : index
    %c0_121 = arith.constant 0 : index
    %365 = vector.load %arg12[%364, %c0_120, %c0_121] : memref<8x8x128xf32, #tpu.memory_space<vmem>>, vector<1x8x128xf32>
    %366 = vector.shape_cast %365 : vector<1x8x128xf32> to vector<8x128xf32>
    %cst_122 = arith.constant dense<0.000000e+00> : vector<8x128xf32>
    %367 = tpu.matmul %363, %213, %cst_122 {dimension_numbers = #tpu.dot_dimension_numbers<[1], [0], [0], [1], [0, 0, 1, 1], [], []>} : vector<8x32xf32>, vector<32x128xf32>, vector<8x128xf32> -> vector<8x128xf32>
    %368 = arith.addf %366, %367 : vector<8x128xf32>
    %369 = arith.negf %368 : vector<8x128xf32>
    %370 = math.exp %369 : vector<8x128xf32>
    %cst_123 = arith.constant 1.000000e+00 : f32
    %371 = vector.broadcast %cst_123 : f32 to vector<8x128xf32>
    %372 = arith.addf %371, %370 : vector<8x128xf32>
    %373 = arith.divf %371, %372 : vector<8x128xf32>
    %374 = math.tanh %368 : vector<8x128xf32>
    %375 = vector.extract_strided_slice %373 {offsets = [0, 0], sizes = [8, 32], strides = [1, 1]} : vector<8x128xf32> to vector<8x32xf32>
    %376 = vector.extract_strided_slice %373 {offsets = [0, 32], sizes = [8, 32], strides = [1, 1]} : vector<8x128xf32> to vector<8x32xf32>
    %377 = vector.extract_strided_slice %374 {offsets = [0, 64], sizes = [8, 32], strides = [1, 1]} : vector<8x128xf32> to vector<8x32xf32>
    %378 = vector.extract_strided_slice %373 {offsets = [0, 96], sizes = [8, 32], strides = [1, 1]} : vector<8x128xf32> to vector<8x32xf32>
    %379 = arith.mulf %376, %361 : vector<8x32xf32>
    %380 = arith.mulf %375, %377 : vector<8x32xf32>
    %381 = arith.addf %379, %380 : vector<8x32xf32>
    %382 = math.tanh %381 : vector<8x32xf32>
    %383 = arith.mulf %378, %382 : vector<8x32xf32>
    %c8_i32_124 = arith.constant 8 : i32
    %c0_125 = arith.constant 0 : index
    %c0_126 = arith.constant 0 : index
    %384 = vector.load %arg8[%c0_125, %c0_126] : memref<32x4xf32, #tpu.memory_space<vmem>>, vector<32x4xf32>
    %cst_127 = arith.constant dense<0.000000e+00> : vector<8x4xf32>
    %385 = tpu.matmul %383, %384, %cst_127 {dimension_numbers = #tpu.dot_dimension_numbers<[1], [0], [0], [1], [0, 0, 1, 1], [], []>} : vector<8x32xf32>, vector<32x4xf32>, vector<8x4xf32> -> vector<8x4xf32>
    %c0_128 = arith.constant 0 : index
    %c0_129 = arith.constant 0 : index
    %386 = vector.load %arg9[%c0_128, %c0_129] : memref<1x4xf32, #tpu.memory_space<vmem>>, vector<1x4xf32>
    %387 = vector.broadcast %386 : vector<1x4xf32> to vector<8x4xf32>
    %388 = arith.addf %385, %387 : vector<8x4xf32>
    %c0_130 = arith.constant 0 : index
    %c0_131 = arith.constant 0 : index
    %389 = vector.load %arg10[%c0_130, %c0_131] : memref<8x4xf32, #tpu.memory_space<vmem>>, vector<8x4xf32>
    tpu.vector_store %arg10[%c0_130, %c0_131], %388 {strides = array<i32>} : memref<8x4xf32, #tpu.memory_space<vmem>>, vector<8x4xf32>,
    return
  }
  func.func @transform_0(%arg0: i32) -> (i32, i32, i32) {
    %c0_i32 = arith.constant 0 : i32
    %c0_i32_0 = arith.constant 0 : i32
    %c0_i32_1 = arith.constant 0 : i32
    return %c0_i32, %arg0, %c0_i32_0 : i32, i32, i32
  }
  func.func @transform_1(%arg0: i32) -> (i32, i32) {
    %c0_i32 = arith.constant 0 : i32
    %c0_i32_0 = arith.constant 0 : i32
    %c0_i32_1 = arith.constant 0 : i32
    return %c0_i32, %c0_i32_0 : i32, i32
  }
  func.func @transform_2(%arg0: i32) -> (i32, i32) {
    %c0_i32 = arith.constant 0 : i32
    %c0_i32_0 = arith.constant 0 : i32
    %c0_i32_1 = arith.constant 0 : i32
    return %c0_i32, %c0_i32_0 : i32, i32
  }
  func.func @transform_3(%arg0: i32) -> (i32, i32) {
    %c0_i32 = arith.constant 0 : i32
    %c0_i32_0 = arith.constant 0 : i32
    %c0_i32_1 = arith.constant 0 : i32
    return %c0_i32, %c0_i32_0 : i32, i32
  }
  func.func @transform_4(%arg0: i32) -> (i32, i32) {
    %c0_i32 = arith.constant 0 : i32
    %c0_i32_0 = arith.constant 0 : i32
    %c0_i32_1 = arith.constant 0 : i32
    return %c0_i32, %c0_i32_0 : i32, i32
  }
  func.func @transform_5(%arg0: i32) -> (i32, i32) {
    %c0_i32 = arith.constant 0 : i32
    %c0_i32_0 = arith.constant 0 : i32
    %c0_i32_1 = arith.constant 0 : i32
    return %c0_i32, %c0_i32_0 : i32, i32
  }
  func.func @transform_6(%arg0: i32) -> (i32, i32) {
    %c0_i32 = arith.constant 0 : i32
    %c0_i32_0 = arith.constant 0 : i32
    %c0_i32_1 = arith.constant 0 : i32
    return %c0_i32, %c0_i32_0 : i32, i32
  }
  func.func @transform_7(%arg0: i32) -> (i32, i32) {
    %c0_i32 = arith.constant 0 : i32
    %c0_i32_0 = arith.constant 0 : i32
    %c0_i32_1 = arith.constant 0 : i32
    return %c0_i32, %c0_i32_0 : i32, i32
  }
  func.func @transform_8(%arg0: i32) -> (i32, i32) {
    %c0_i32 = arith.constant 0 : i32
    %c0_i32_0 = arith.constant 0 : i32
    %c0_i32_1 = arith.constant 0 : i32
    return %c0_i32, %c0_i32_0 : i32, i32
  }
  func.func @transform_9(%arg0: i32) -> (i32, i32) {
    %c0_i32 = arith.constant 0 : i32
    %c0_i32_0 = arith.constant 0 : i32
    return %arg0, %c0_i32 : i32, i32
  }
}

</mosaic_0001>

<bundles_post_ra>
// kernel: simple_lstm_forward.1
= control target key start
LH: loop header
LB: loop body
LE: loop exit
PB: predicated region body
PF: predicated region fallthrough
CT: control target
= control target key end

     0   :  { %vm77_vm0 = vcmask 1043456   ;;  %vm52_vm1 = vcmask 31744   ;;  %v2598_v0 = vmov 0.0   ;;  %vm2599_vm2 = vmmov 0   ;;  %s2600_s23 = smov 64   ;;  %s3078_s1 = inlined_call_operand.vmem [shape: f32[4,128], index: 1, kind: input, shape index: {}]   ;;  %s3079_s2 = inlined_call_operand.vmem [shape: f32[32,128], index: 2, kind: input, shape index: {}]   ;;  %s3080_s0 = inlined_call_operand.vmem [shape: f32[8,8,4], index: 0, kind: input, shape index: {}]   ;;  %s3081_s3 = inlined_call_operand.vmem [shape: f32[1,128], index: 3, kind: input, shape index: {}]   ;;  %s3082_s4 = inlined_call_operand.vmem [shape: f32[32,128], index: 4, kind: input, shape index: {}]   ;;  %s3083_s5 = inlined_call_operand.vmem [shape: f32[32,128], index: 5, kind: input, shape index: {}]   ;;  %s3084_s6 = inlined_call_operand.vmem [shape: f32[1,128], index: 6, kind: input, shape index: {}]   ;;  %s3085_s7 = inlined_call_operand.vmem [shape: f32[32,4], index: 7, kind: input, shape index: {}]   ;;  %s3086_s8 = inlined_call_operand.vmem [shape: f32[1,4], index: 8, kind: input, shape index: {}]   ;;  %s3087_s9 = inlined_call_operand.vmem [shape: f32[8,4], index: 9, kind: output, shape index: {}]  }
   0x1   :  { %2259 = vmatprep.subr.mxu1 %v2598_v0  ;;  %v32_v1 = vld [vmem:[%s3078_s1] sm:$0xf]  ;;  %v2659_v2 = vld [vmem:[%s3079_s2 + $0x18] sm:$0xff]  ;;  %2267 = vmatprep.mubr.msk.f32.mxu1 %vm2599_vm2, %v2598_v0  ;;  %v39_v4 = vld [vmem:[%s3080_s0 + $0x8] sm:$0xff]  ;;  %vm195_vm3 = vcmask 261120  }
   0x2   :  { %v38_v3 = vld [vmem:[%s3080_s0] sm:$0xff]  ;;  %2245 = vmatprep.subr.msk.mxu0 %vm77_vm0, %v32_v1  ;;  %2260 = vmatpush3.msra.mxu1 %v2659_v2  ;;  %v2673_v5 = vld [vmem:[%s3079_s2 + $0x10] sm:$0xff]  ;;  %v2681_v6 = vld [vmem:[%s3079_s2 + $0x8] sm:$0xff] }
   0x3   :  { %2246 = vmatpush3.msk.msra.mxu0 %vm77_vm0, %v32_v1  ;;  %2247 = vmatprep.mubr.msk.f32.mxu0 %vm52_vm1, %v38_v3  ;;  %v2689_v7 = vld [vmem:[%s3079_s2] sm:$0xff]  ;;  %v40_v43 = vld [vmem:[%s3080_s0 + $0x10] sm:$0xff]  ;;  %v41_v44 = vld [vmem:[%s3080_s0 + $0x18] sm:$0xff] }
   0x4   :  { %2261 = vmatprep.subr.mxu1 %v2598_v0  ;;  %2248 = vmatmul.mubr.msk.f32.vlgmr.msra.gmra.mxu0 %vm52_vm1, %v39_v4  ;;  %v2717_v9 = vld [vmem:[%s3081_s3] ss:$0 sm:$0xff]  ;;  %s2601_s3 = smov 32   ;;  %v43_v46 = vld [vmem:[%s3080_s0 + $0x28] sm:$0xff]  ;;  %v44_v47 = vld [vmem:[%s3080_s0 + $0x30] sm:$0xff] }
   0x5   :  { %2262 = vmatpush3.msra.mxu1 %v2673_v5  ;;  %2281 = vmatprep.subr.mxu0 %v2598_v0  ;;  %v42_v45 = vld [vmem:[%s3080_s0 + $0x20] sm:$0xff]  ;;  %v45_v48 = vld [vmem:[%s3080_s0 + $0x38] sm:$0xff] }
   0x6   :  { %2263 = vmatprep.subr.mxu1 %v2598_v0  ;;  %2282 = vmatpush3.msra.mxu0 %v2659_v2 }
   0x7   :  { %2264 = vmatpush3.msra.mxu1 %v2681_v6  ;;  %2283 = vmatprep.subr.mxu0 %v2598_v0 }
   0x8   :  { %2265 = vmatprep.subr.mxu1 %v2598_v0  ;;  %2284 = vmatpush3.msra.mxu0 %v2673_v5 }
   0x9   :  { %2266 = vmatpush3.msra.mxu1 %v2689_v7  ;;  %2285 = vmatprep.subr.mxu0 %v2598_v0 }
   0xa   :  { %2268 = vmatmul.mubr.f32.vlgmr.msra.gmra.mxu1 %v2598_v0  ;;  %2270 = vmatprep.subr.mxu1 %v2598_v0 }
   0xb   :  { %2271 = vmatpush3.msra.mxu1 %v2659_v2  ;;  %2278 = vmatprep.mubr.msk.f32.mxu1 %vm2599_vm2, %v2598_v0 }
   0xc   :  { %2272 = vmatprep.subr.mxu1 %v2598_v0  ;;  %2286 = vmatpush3.msra.mxu0 %v2681_v6 }
   0xd   :  { %2273 = vmatpush3.msra.mxu1 %v2673_v5  ;;  %2287 = vmatprep.subr.mxu0 %v2598_v0 }
   0xe   :  { %2274 = vmatprep.subr.mxu1 %v2598_v0  ;;  %2288 = vmatpush3.msra.mxu0 %v2689_v7 }
   0xf   :  { %2275 = vmatpush3.msra.mxu1 %v2681_v6  ;;  %2303 = vmatprep.subr.mxu0 %v2598_v0 }
  0x10   :  { %2276 = vmatprep.subr.mxu1 %v2598_v0  ;;  %2250 = vmatprep.mubr.msk.f32.mxu0 %vm52_vm1, %v40_v43 }
  0x11   :  { %2277 = vmatpush3.msra.mxu1 %v2689_v7  ;;  %2251 = vmatmul.mubr.msk.f32.gmra.mxu0 %vm52_vm1, %v41_v44 }
  0x12   :  { %2292 = vmatprep.subr.mxu1 %v2598_v0  ;;  %2253 = vmatprep.mubr.msk.f32.mxu0 %vm52_vm1, %v42_v45 }
  0x15   :  { %2254 = vmatmul.mubr.msk.f32.gmra.mxu0 %vm52_vm1, %v43_v46 }
  0x16   :  { %2256 = vmatprep.mubr.msk.f32.mxu0 %vm52_vm1, %v44_v47 }
  0x19   :  { %2257 = vmatmul.mubr.msk.f32.gmra.mxu0 %vm52_vm1, %v45_v48 }
  0x1a   :  { %2289 = vmatprep.mubr.msk.f32.mxu0 %vm2599_vm2, %v2598_v0 }
  0xc4   :  { %v2249_v8 = vpop.f32.mrf.mxu0 }
  0xc5   :  { %v153_v29 = vadd.f32 %v2249_v8, %v2717_v9 }
  0xc6   :  { %v147_v10 = vpop.f32.mrf.mxu0 }
  0xc7   :  { %v148_v11 = vadd.f32 %v2717_v9, %v147_v10 }
  0xca   :  { %v265_v12 = vpop.f32.mrf.mxu1 }
  0xcb   :  { %v269_v13 = vadd.f32 %v265_v12, %v148_v11 }
  0xcc   :  { %v2269_v14 = vpop.f32.mrf.mxu1 }
  0xcd   :  { %2470 = vtanh.f32 %v269_v13  ;;  %v2098_v16 = vmul.f32 -1.442695, %v269_v13 }
  0xcf   :  { %2472 = vpow2.f32 %v2098_v16 }
  0xd1   :  { %v2252_v53 = vpop.f32.mrf.mxu0 }
  0xd3   :  { %v157_v54 = vpop.f32.mrf.mxu0 }
  0xd4   :  { %v158_v59 = vadd.f32 %v2717_v9, %v157_v54 }
  0xd5   :  { %v2779_v55 = vpop.f32.mrf.mxu0 }
  0xd7   :  { %v2781_v56 = vpop.f32.mrf.mxu0 }
  0xd9   :  { %v2783_v57 = vpop.f32.mrf.mxu0 }
  0xda   :  { %v2471_v15 = vpop.eup %2470 }
  0xdb   :  { %279 = vrot.lane.b32.xlu0 %v2471_v15, %s2600_s23  ;;  %v2785_v58 = vpop.f32.mrf.mxu0 }
  0xdc   :  { %v2473_v17 = vpop.eup %2472 }
  0xdd   :  { %v273_v18 = vadd.f32 1.0, %v2473_v17 }
  0xdf   :  { %2474 = vrcp.f32 %v273_v18 }
  0xec   :  { %v2475_v19 = vpop.eup %2474 }
  0xed   :  { %v277_v22 = vmul.f32 0.0, %v2475_v19 }
 0x14d   :  { %v280_v20 = vpop.permute.xlu0 %279 }
 0x14e   :  { %v282_v21 = vmul.f32 %v2475_v19, %v280_v20 }
 0x150   :  { %284 = vrot.lane.b32.xlu0 %v282_v21, %s2601_s3 }
 0x1c2   :  { %v285_v23 = vpop.permute.xlu0 %284 }
 0x1c3   :  { %v287_v24 = vadd.f32 %v285_v23, %v277_v22 }
 0x1c5   :  { %2476 = vtanh.f32 %v287_v24 }
 0x1d2   :  { %v2477_v25 = vpop.eup %2476 }
 0x1d3   :  { %290 = vrot.lane.b32.xlu1 %v2477_v25, %s2600_s23 }
 0x245   :  { %v291_v26 = vpop.permute.xlu1 %290 }
 0x246   :  { %v293_v27 = vmul.f32 %v2475_v19, %v291_v26  ;;  %v163_v19 = vadd.f32 %v2252_v53, %v2717_v9 }
 0x248   :  { %295 = vrot.lane.b32.xlu1 %v293_v27, %s2601_s3 }
 0x2ba   :  { %v296_v28 = vpop.permute.xlu1 %295 }
 0x2bb   :  { %298 = vst.msk [vmem:[#allocation2] sm:$0xff] %vm195_vm3, %v296_v28  ;;  %2279 = vmatmul.mubr.msk.f32.vlgmr.msra.gmra.mxu1 %vm195_vm3, %v296_v28 }
 0x2bc   :  { %2293 = vmatpush3.msra.mxu1 %v2659_v2  ;;  %2300 = vmatprep.mubr.msk.f32.mxu1 %vm2599_vm2, %v2598_v0 }
 0x2bd   :  { %2294 = vmatprep.subr.mxu1 %v2598_v0 }
 0x2be   :  { %2295 = vmatpush3.msra.mxu1 %v2673_v5 }
 0x2bf   :  { %2296 = vmatprep.subr.mxu1 %v2598_v0 }
 0x2c0   :  { %2297 = vmatpush3.msra.mxu1 %v2681_v6 }
 0x2c1   :  { %2298 = vmatprep.subr.mxu1 %v2598_v0 }
 0x2c2   :  { %2299 = vmatpush3.msra.mxu1 %v2689_v7 }
 0x2c3   :  { %2314 = vmatprep.subr.mxu1 %v2598_v0 }
 0x37b   :  { %v369_v30 = vpop.f32.mrf.mxu1 }
 0x37c   :  { %v373_v31 = vadd.f32 %v369_v30, %v153_v29 }
 0x37d   :  { %v2280_v32 = vpop.f32.mrf.mxu1 }
 0x37e   :  { %2478 = vtanh.f32 %v373_v31  ;;  %v2100_v34 = vmul.f32 -1.442695, %v373_v31 }
 0x380   :  { %2480 = vpow2.f32 %v2100_v34 }
 0x38b   :  { %v2479_v33 = vpop.eup %2478 }
 0x38c   :  { %383 = vrot.lane.b32.xlu0 %v2479_v33, %s2600_s23 }
 0x38d   :  { %v2481_v35 = vpop.eup %2480 }
 0x38e   :  { %v377_v36 = vadd.f32 1.0, %v2481_v35 }
 0x390   :  { %2482 = vrcp.f32 %v377_v36 }
 0x39d   :  { %v2483_v37 = vpop.eup %2482 }
 0x39e   :  { %v381_v40 = vmul.f32 %v2483_v37, %v287_v24 }
 0x3fe   :  { %v384_v38 = vpop.permute.xlu0 %383 }
 0x3ff   :  { %v386_v39 = vmul.f32 %v2483_v37, %v384_v38 }
 0x401   :  { %388 = vrot.lane.b32.xlu1 %v386_v39, %s2601_s3 }
 0x473   :  { %v389_v41 = vpop.permute.xlu1 %388 }
 0x474   :  { %v391_v42 = vadd.f32 %v389_v41, %v381_v40 }
 0x476   :  { %2484 = vtanh.f32 %v391_v42 }
 0x483   :  { %v2485_v49 = vpop.eup %2484 }
 0x484   :  { %394 = vrot.lane.b32.xlu0 %v2485_v49, %s2600_s23 }
 0x4f6   :  { %v395_v50 = vpop.permute.xlu0 %394 }
 0x4f7   :  { %v397_v51 = vmul.f32 %v2483_v37, %v395_v50  ;;  %v168_v37 = vadd.f32 %v2717_v9, %v2781_v56 }
 0x4f9   :  { %399 = vrot.lane.b32.xlu1 %v397_v51, %s2601_s3 }
 0x56b   :  { %v400_v52 = vpop.permute.xlu1 %399 }
 0x56c   :  { %403 = vst.msk [vmem:[#allocation2 + $0x8] sm:$0xff] %vm195_vm3, %v400_v52  ;;  %2290 = vmatmul.mubr.msk.f32.vlgmr.msra.gmra.mxu0 %vm195_vm3, %v400_v52 }
 0x56d   :  { %2304 = vmatpush3.msra.mxu0 %v2659_v2  ;;  %2311 = vmatprep.mubr.msk.f32.mxu0 %vm2599_vm2, %v2598_v0 }
 0x56e   :  { %2305 = vmatprep.subr.mxu0 %v2598_v0 }
 0x56f   :  { %2306 = vmatpush3.msra.mxu0 %v2673_v5 }
 0x570   :  { %2307 = vmatprep.subr.mxu0 %v2598_v0 }
 0x571   :  { %2308 = vmatpush3.msra.mxu0 %v2681_v6 }
 0x572   :  { %2309 = vmatprep.subr.mxu0 %v2598_v0 }
 0x573   :  { %2310 = vmatpush3.msra.mxu0 %v2689_v7 }
 0x574   :  { %2325 = vmatprep.subr.mxu0 %v2598_v0 }
 0x62c   :  { %v474_v60 = vpop.f32.mrf.mxu0 }
 0x62d   :  { %v478_v61 = vadd.f32 %v474_v60, %v158_v59 }
 0x62e   :  { %v2291_v62 = vpop.f32.mrf.mxu0 }
 0x62f   :  { %2486 = vtanh.f32 %v478_v61  ;;  %v2102_v1 = vmul.f32 -1.442695, %v478_v61 }
 0x631   :  { %2488 = vpow2.f32 %v2102_v1 }
 0x63c   :  { %v2487_v63 = vpop.eup %2486 }
 0x63d   :  { %488 = vrot.lane.b32.xlu0 %v2487_v63, %s2600_s23 }
 0x63e   :  { %v2489_v3 = vpop.eup %2488 }
 0x63f   :  { %v482_v4 = vadd.f32 1.0, %v2489_v3 }
 0x641   :  { %2490 = vrcp.f32 %v482_v4 }
 0x64e   :  { %v2491_v8 = vpop.eup %2490 }
 0x64f   :  { %v486_v12 = vmul.f32 %v2491_v8, %v391_v42 }
 0x6af   :  { %v489_v10 = vpop.permute.xlu0 %488 }
 0x6b0   :  { %v491_v11 = vmul.f32 %v2491_v8, %v489_v10 }
 0x6b2   :  { %493 = vrot.lane.b32.xlu1 %v491_v11, %s2601_s3 }
 0x724   :  { %v494_v13 = vpop.permute.xlu1 %493 }
 0x725   :  { %v496_v14 = vadd.f32 %v494_v13, %v486_v12 }
 0x727   :  { %2492 = vtanh.f32 %v496_v14 }
 0x734   :  { %v2493_v15 = vpop.eup %2492 }
 0x735   :  { %499 = vrot.lane.b32.xlu0 %v2493_v15, %s2600_s23  ;;  %v1043_v15 = vld [vmem:[#allocation2] sm:$0xff] }
 0x7a7   :  { %v500_v16 = vpop.permute.xlu0 %499 }
 0x7a8   :  { %v502_v17 = vmul.f32 %v2491_v8, %v500_v16  ;;  %v1037_v8 = vld [vmem:[%s3082_s4 + $0x18] sm:$0xff]  ;;  %v1035_v16 = vld [vmem:[%s3082_s4 + $0x8] sm:$0xff] }
 0x7aa   :  { %504 = vrot.lane.b32.xlu1 %v502_v17, %s2601_s3  ;;  %v1034_v17 = vld [vmem:[%s3082_s4] sm:$0xff] }
 0x81c   :  { %v505_v18 = vpop.permute.xlu1 %504 }
 0x81d   :  { %508 = vst.msk [vmem:[#allocation2 + $0x10] sm:$0xff] %vm195_vm3, %v505_v18  ;;  %2301 = vmatmul.mubr.msk.f32.vlgmr.msra.gmra.mxu1 %vm195_vm3, %v505_v18  ;;  %v1044_v18 = vld [vmem:[#allocation2 + $0x8] sm:$0xff] }
 0x81e   :  { %2315 = vmatpush3.msra.mxu1 %v2659_v2  ;;  %2322 = vmatprep.mubr.msk.f32.mxu1 %vm2599_vm2, %v2598_v0 }
 0x81f   :  { %2316 = vmatprep.subr.mxu1 %v2598_v0 }
 0x820   :  { %2317 = vmatpush3.msra.mxu1 %v2673_v5 }
 0x821   :  { %2318 = vmatprep.subr.mxu1 %v2598_v0 }
 0x822   :  { %2319 = vmatpush3.msra.mxu1 %v2681_v6 }
 0x823   :  { %2320 = vmatprep.subr.mxu1 %v2598_v0 }
 0x824   :  { %2321 = vmatpush3.msra.mxu1 %v2689_v7 }
 0x825   :  { %2336 = vmatprep.subr.mxu1 %v2598_v0 }
 0x8dd   :  { %v579_v20 = vpop.f32.mrf.mxu1 }
 0x8de   :  { %v583_v21 = vadd.f32 %v579_v20, %v163_v19  ;;  %v1045_v19 = vld [vmem:[#allocation2 + $0x10] sm:$0xff] }
 0x8df   :  { %v2302_v22 = vpop.f32.mrf.mxu1 }
 0x8e0   :  { %2494 = vtanh.f32 %v583_v21  ;;  %v2104_v24 = vmul.f32 -1.442695, %v583_v21 }
 0x8e2   :  { %2496 = vpow2.f32 %v2104_v24 }
 0x8ed   :  { %v2495_v23 = vpop.eup %2494 }
 0x8ee   :  { %593 = vrot.lane.b32.xlu0 %v2495_v23, %s2600_s23  ;;  %v178_v23 = vadd.f32 %v2717_v9, %v2785_v58 }
 0x8ef   :  { %v2497_v25 = vpop.eup %2496 }
 0x8f0   :  { %v587_v26 = vadd.f32 1.0, %v2497_v25 }
 0x8f2   :  { %2498 = vrcp.f32 %v587_v26 }
 0x8ff   :  { %v2499_v27 = vpop.eup %2498 }
 0x900   :  { %v591_v30 = vmul.f32 %v2499_v27, %v496_v14  ;;  %v1036_v14 = vld [vmem:[%s3082_s4 + $0x10] sm:$0xff] }
 0x960   :  { %v594_v28 = vpop.permute.xlu0 %593 }
 0x961   :  { %v596_v29 = vmul.f32 %v2499_v27, %v594_v28 }
 0x963   :  { %598 = vrot.lane.b32.xlu1 %v596_v29, %s2601_s3 }
 0x9d5   :  { %v599_v31 = vpop.permute.xlu1 %598 }
 0x9d6   :  { %v601_v32 = vadd.f32 %v599_v31, %v591_v30 }
 0x9d8   :  { %2500 = vtanh.f32 %v601_v32 }
 0x9e5   :  { %v2501_v33 = vpop.eup %2500 }
 0x9e6   :  { %604 = vrot.lane.b32.xlu0 %v2501_v33, %s2600_s23 }
 0xa58   :  { %v605_v34 = vpop.permute.xlu0 %604 }
 0xa59   :  { %v607_v35 = vmul.f32 %v2499_v27, %v605_v34 }
 0xa5b   :  { %609 = vrot.lane.b32.xlu1 %v607_v35, %s2601_s3 }
 0xacd   :  { %v610_v36 = vpop.permute.xlu1 %609 }
 0xace   :  { %613 = vst.msk [vmem:[#allocation2 + $0x18] sm:$0xff] %vm195_vm3, %v610_v36  ;;  %2312 = vmatmul.mubr.msk.f32.vlgmr.msra.gmra.mxu0 %vm195_vm3, %v610_v36 }
 0xacf   :  { %2326 = vmatpush3.msra.mxu0 %v2659_v2  ;;  %2333 = vmatprep.mubr.msk.f32.mxu0 %vm2599_vm2, %v2598_v0 }
 0xad0   :  { %2327 = vmatprep.subr.mxu0 %v2598_v0 }
 0xad1   :  { %2328 = vmatpush3.msra.mxu0 %v2673_v5 }
 0xad2   :  { %2329 = vmatprep.subr.mxu0 %v2598_v0 }
 0xad3   :  { %2330 = vmatpush3.msra.mxu0 %v2681_v6 }
 0xad4   :  { %2331 = vmatprep.subr.mxu0 %v2598_v0 }
 0xad5   :  { %2332 = vmatpush3.msra.mxu0 %v2689_v7  ;;  %v1046_v20 = vld [vmem:[#allocation2 + $0x18] sm:$0xff] }
 0xad6   :  { %2347 = vmatprep.subr.mxu0 %v1037_v8 }
 0xb8e   :  { %v684_v38 = vpop.f32.mrf.mxu0 }
 0xb8f   :  { %v688_v39 = vadd.f32 %v684_v38, %v168_v37  ;;  %v2876_v37 = vld [vmem:[%s3083_s5 + $0x18] sm:$0xff]  ;;  %v2882_v38 = vld [vmem:[%s3083_s5 + $0x10] sm:$0xff] }
 0xb90   :  { %v2313_v40 = vpop.f32.mrf.mxu0 }
 0xb91   :  { %2502 = vtanh.f32 %v688_v39  ;;  %v2106_v42 = vmul.f32 -1.442695, %v688_v39  ;;  %v2889_v39 = vld [vmem:[%s3083_s5 + $0x8] sm:$0xff]  ;;  %v2896_v40 = vld [vmem:[%s3083_s5] sm:$0xff] }
 0xb93   :  { %2504 = vpow2.f32 %v2106_v42 }
 0xb9e   :  { %v2503_v41 = vpop.eup %2502 }
 0xb9f   :  { %698 = vrot.lane.b32.xlu0 %v2503_v41, %s2600_s23 }
 0xba0   :  { %v2505_v43 = vpop.eup %2504 }
 0xba1   :  { %v692_v44 = vadd.f32 1.0, %v2505_v43 }
 0xba3   :  { %2506 = vrcp.f32 %v692_v44 }
 0xbb0   :  { %v2507_v45 = vpop.eup %2506 }
 0xbb1   :  { %v696_v48 = vmul.f32 %v2507_v45, %v601_v32 }
 0xc11   :  { %v699_v46 = vpop.permute.xlu0 %698 }
 0xc12   :  { %v701_v47 = vmul.f32 %v2507_v45, %v699_v46 }
 0xc14   :  { %703 = vrot.lane.b32.xlu1 %v701_v47, %s2601_s3 }
 0xc86   :  { %v704_v49 = vpop.permute.xlu1 %703 }
 0xc87   :  { %v706_v50 = vadd.f32 %v704_v49, %v696_v48 }
 0xc89   :  { %2508 = vtanh.f32 %v706_v50 }
 0xc96   :  { %v2509_v51 = vpop.eup %2508 }
 0xc97   :  { %709 = vrot.lane.b32.xlu0 %v2509_v51, %s2600_s23  ;;  %v2933_v51 = vld [vmem:[%s3084_s6] ss:$0 sm:$0xff] }
 0xd09   :  { %v710_v52 = vpop.permute.xlu0 %709 }
 0xd0a   :  { %v712_v53 = vmul.f32 %v2507_v45, %v710_v52  ;;  %v183_v45 = vadd.f32 %v2783_v57, %v2717_v9 }
 0xd0c   :  { %714 = vrot.lane.b32.xlu1 %v712_v53, %s2601_s3 }
 0xd7e   :  { %v715_v54 = vpop.permute.xlu1 %714 }
 0xd7f   :  { %718 = vst.msk [vmem:[#allocation2 + $0x20] sm:$0xff] %vm195_vm3, %v715_v54  ;;  %2323 = vmatmul.mubr.msk.f32.vlgmr.msra.gmra.mxu1 %vm195_vm3, %v715_v54 }
 0xd80   :  { %2337 = vmatpush3.msra.mxu1 %v2659_v2  ;;  %2344 = vmatprep.mubr.msk.f32.mxu1 %vm2599_vm2, %v2598_v0  ;;  %v173_v2 = vadd.f32 %v2779_v55, %v2717_v9 }
 0xd81   :  { %2338 = vmatprep.subr.mxu1 %v2598_v0 }
 0xd82   :  { %2339 = vmatpush3.msra.mxu1 %v2673_v5 }
 0xd83   :  { %2340 = vmatprep.subr.mxu1 %v2598_v0 }
 0xd84   :  { %2341 = vmatpush3.msra.mxu1 %v2681_v6 }
 0xd85   :  { %2342 = vmatprep.subr.mxu1 %v2598_v0 }
 0xd86   :  { %2343 = vmatpush3.msra.mxu1 %v2689_v7  ;;  %v1047_v21 = vld [vmem:[#allocation2 + $0x20] sm:$0xff] }
 0xd87   :  { %2367 = vmatprep.subr.mxu1 %v2598_v0 }
 0xe3f   :  { %v789_v56 = vpop.f32.mrf.mxu1 }
 0xe40   :  { %v793_v59 = vadd.f32 %v789_v56, %v173_v2 }
 0xe41   :  { %v2324_v60 = vpop.f32.mrf.mxu1 }
 0xe42   :  { %2510 = vtanh.f32 %v793_v59  ;;  %v2108_v5 = vmul.f32 -1.442695, %v793_v59 }
 0xe44   :  { %2512 = vpow2.f32 %v2108_v5 }
 0xe4f   :  { %v2511_v61 = vpop.eup %2510 }
 0xe50   :  { %803 = vrot.lane.b32.xlu0 %v2511_v61, %s2600_s23 }
 0xe51   :  { %v2513_v62 = vpop.eup %2512 }
 0xe52   :  { %v797_v6 = vadd.f32 1.0, %v2513_v62 }
 0xe54   :  { %2514 = vrcp.f32 %v797_v6 }
 0xe61   :  { %v2515_v63 = vpop.eup %2514 }
 0xe62   :  { %v801_v3 = vmul.f32 %v2515_v63, %v706_v50 }
 0xec2   :  { %v804_v1 = vpop.permute.xlu0 %803 }
 0xec3   :  { %v806_v7 = vmul.f32 %v2515_v63, %v804_v1 }
 0xec5   :  { %808 = vrot.lane.b32.xlu1 %v806_v7, %s2601_s3 }
 0xf37   :  { %v809_v4 = vpop.permute.xlu1 %808 }
 0xf38   :  { %v811_v55 = vadd.f32 %v809_v4, %v801_v3 }
 0xf3a   :  { %2516 = vtanh.f32 %v811_v55 }
 0xf47   :  { %v2517_v10 = vpop.eup %2516 }
 0xf48   :  { %814 = vrot.lane.b32.xlu0 %v2517_v10, %s2600_s23 }
 0xfba   :  { %v815_v11 = vpop.permute.xlu0 %814 }
 0xfbb   :  { %v817_v12 = vmul.f32 %v2515_v63, %v815_v11 }
 0xfbd   :  { %819 = vrot.lane.b32.xlu1 %v817_v12, %s2601_s3 }
0x102f   :  { %v820_v13 = vpop.permute.xlu1 %819 }
0x1030   :  { %823 = vst.msk [vmem:[#allocation2 + $0x28] sm:$0xff] %vm195_vm3, %v820_v13  ;;  %2334 = vmatmul.mubr.msk.f32.vlgmr.msra.gmra.mxu0 %vm195_vm3, %v820_v13 }
0x1031   :  { %2348 = vmatpush3.msra.mxu0 %v1037_v8  ;;  %2355 = vmatprep.mubr.msk.f32.mxu0 %vm195_vm3, %v1043_v15 }
0x1032   :  { %2349 = vmatprep.subr.mxu0 %v1036_v14 }
0x1033   :  { %2350 = vmatpush3.msra.mxu0 %v1036_v14 }
0x1034   :  { %2351 = vmatprep.subr.mxu0 %v1035_v16 }
0x1035   :  { %2352 = vmatpush3.msra.mxu0 %v1035_v16 }
0x1036   :  { %2353 = vmatprep.subr.mxu0 %v1034_v17 }
0x1037   :  { %2354 = vmatpush3.msra.mxu0 %v1034_v17  ;;  %v1048_v22 = vld [vmem:[#allocation2 + $0x28] sm:$0xff] }
0x1038   :  { %2356 = vmatmul.mubr.msk.f32.vlgmr.msra.gmra.mxu0 %vm195_vm3, %v1044_v18  ;;  %2389 = vmatprep.subr.mxu0 %v2598_v0 }
0x1039   :  { %2358 = vmatprep.mubr.msk.f32.mxu0 %vm195_vm3, %v1045_v19  ;;  %2390 = vmatpush3.msra.mxu0 %v2876_v37 }
0x103a   :  { %2391 = vmatprep.subr.mxu0 %v2598_v0 }
0x103b   :  { %2392 = vmatpush3.msra.mxu0 %v2882_v38 }
0x103c   :  { %2359 = vmatmul.mubr.msk.f32.gmra.mxu0 %vm195_vm3, %v1046_v20  ;;  %2393 = vmatprep.subr.mxu0 %v2598_v0 }
0x103d   :  { %2361 = vmatprep.mubr.msk.f32.mxu0 %vm195_vm3, %v1047_v21  ;;  %2394 = vmatpush3.msra.mxu0 %v2889_v39 }
0x103e   :  { %2395 = vmatprep.subr.mxu0 %v2598_v0 }
0x103f   :  { %2396 = vmatpush3.msra.mxu0 %v2896_v40 }
0x1040   :  { %2362 = vmatmul.mubr.msk.f32.gmra.mxu0 %vm195_vm3, %v1048_v22  ;;  %2411 = vmatprep.subr.mxu0 %v2598_v0 }
0x10f0   :  { %v894_v24 = vpop.f32.mrf.mxu0 }
0x10f1   :  { %v898_v25 = vadd.f32 %v894_v24, %v178_v23 }
0x10f2   :  { %v2335_v26 = vpop.f32.mrf.mxu0 }
0x10f3   :  { %2518 = vtanh.f32 %v898_v25  ;;  %v2110_v28 = vmul.f32 -1.442695, %v898_v25 }
0x10f5   :  { %2520 = vpow2.f32 %v2110_v28 }
0x10f8   :  { %v2928_v46 = vpop.f32.mrf.mxu0 }
0x10f9   :  { %v1153_v21 = vadd.f32 %v2928_v46, %v2933_v51 }
0x10fa   :  { %v1147_v50 = vpop.f32.mrf.mxu0 }
0x10fb   :  { %v1148_v52 = vadd.f32 %v2933_v51, %v1147_v50 }
0x1100   :  { %v2519_v27 = vpop.eup %2518 }
0x1101   :  { %908 = vrot.lane.b32.xlu0 %v2519_v27, %s2600_s23 }
0x1102   :  { %v2521_v29 = vpop.eup %2520 }
0x1103   :  { %v902_v30 = vadd.f32 1.0, %v2521_v29 }
0x1105   :  { %2522 = vrcp.f32 %v902_v30 }
0x1112   :  { %v2523_v31 = vpop.eup %2522 }
0x1113   :  { %v906_v34 = vmul.f32 %v2523_v31, %v811_v55 }
0x1173   :  { %v909_v32 = vpop.permute.xlu0 %908 }
0x1174   :  { %v911_v33 = vmul.f32 %v2523_v31, %v909_v32 }
0x1176   :  { %913 = vrot.lane.b32.xlu1 %v911_v33, %s2601_s3 }
0x11e8   :  { %v914_v35 = vpop.permute.xlu1 %913 }
0x11e9   :  { %v2869_v58 = vadd.f32 %v914_v35, %v906_v34 }
0x11eb   :  { %2524 = vtanh.f32 %v2869_v58 }
0x11f8   :  { %v2525_v36 = vpop.eup %2524 }
0x11f9   :  { %919 = vrot.lane.b32.xlu0 %v2525_v36, %s2600_s23 }
0x126b   :  { %v920_v41 = vpop.permute.xlu0 %919 }
0x126c   :  { %v922_v42 = vmul.f32 %v2523_v31, %v920_v41 }
0x126e   :  { %924 = vrot.lane.b32.xlu1 %v922_v42, %s2601_s3 }
0x12e0   :  { %v925_v43 = vpop.permute.xlu1 %924 }
0x12e1   :  { %928 = vst.msk [vmem:[#allocation2 + $0x30] sm:$0xff] %vm195_vm3, %v925_v43  ;;  %2345 = vmatmul.mubr.msk.f32.vlgmr.msra.gmra.mxu1 %vm195_vm3, %v925_v43 }
0x12e2   :  { %2368 = vmatpush3.msra.mxu1 %v2876_v37  ;;  %2375 = vmatprep.mubr.msk.f32.mxu1 %vm2599_vm2, %v2598_v0 }
0x12e3   :  { %2369 = vmatprep.subr.mxu1 %v2598_v0 }
0x12e4   :  { %2370 = vmatpush3.msra.mxu1 %v2882_v38 }
0x12e5   :  { %2371 = vmatprep.subr.mxu1 %v2598_v0 }
0x12e6   :  { %2372 = vmatpush3.msra.mxu1 %v2889_v39 }
0x12e7   :  { %2373 = vmatprep.subr.mxu1 %v2598_v0 }
0x12e8   :  { %2374 = vmatpush3.msra.mxu1 %v2896_v40  ;;  %v1049_v44 = vld [vmem:[#allocation2 + $0x30] sm:$0xff] }
0x12e9   :  { %2376 = vmatmul.mubr.f32.vlgmr.msra.gmra.mxu1 %v2598_v0  ;;  %2364 = vmatprep.mubr.msk.f32.mxu0 %vm195_vm3, %v1049_v44  ;;  %v2360_v44 = vpop.f32.mrf.mxu0 }
0x12ea   :  { %2378 = vmatprep.subr.mxu1 %v2598_v0  ;;  %2386 = vmatprep.mubr.msk.f32.mxu1 %vm2599_vm2, %v2598_v0 }
0x12eb   :  { %2379 = vmatpush3.msra.mxu1 %v2876_v37 }
0x12ec   :  { %2380 = vmatprep.subr.mxu1 %v2598_v0 }
0x12ed   :  { %2381 = vmatpush3.msra.mxu1 %v2882_v38 }
0x12ee   :  { %2382 = vmatprep.subr.mxu1 %v2598_v0 }
0x12ef   :  { %2383 = vmatpush3.msra.mxu1 %v2889_v39 }
0x12f0   :  { %2384 = vmatprep.subr.mxu1 %v2598_v0 }
0x12f1   :  { %2385 = vmatpush3.msra.mxu1 %v2896_v40 }
0x12f2   :  { %2400 = vmatprep.subr.mxu1 %v2598_v0 }
0x13a1   :  { %v999_v47 = vpop.f32.mrf.mxu1 }
0x13a2   :  { %v1003_v48 = vadd.f32 %v999_v47, %v183_v45  ;;  %v1157_v45 = vpop.f32.mrf.mxu0 }
0x13a3   :  { %v2346_v49 = vpop.f32.mrf.mxu1  ;;  %v1158_v50 = vadd.f32 %v2933_v51, %v1157_v45 }
0x13a4   :  { %v2112_v3 = vmul.f32 -1.442695, %v1003_v48  ;;  %v2977_v46 = vpop.f32.mrf.mxu0 }
0x13a6   :  { %v2979_v47 = vpop.f32.mrf.mxu0 }
0x13a9   :  { %v1261_v53 = vpop.f32.mrf.mxu1 }
0x13aa   :  { %v1265_v54 = vadd.f32 %v1261_v53, %v1148_v52 }
0x13ab   :  { %v2377_v2 = vpop.f32.mrf.mxu1 }
0x13ac   :  { %2526 = vtanh.f32 %v1265_v54  ;;  %v2122_v9 = vmul.f32 -1.442695, %v1265_v54 }
0x13ae   :  { %2528 = vpow2.f32 %v2122_v9 }
0x13b9   :  { %v2527_v56 = vpop.eup %2526 }
0x13ba   :  { %1275 = vrot.lane.b32.xlu0 %v2527_v56, %s2600_s23 }
0x13bb   :  { %v2529_v57 = vpop.eup %2528 }
0x13bc   :  { %v1269_v59 = vadd.f32 1.0, %v2529_v57 }
0x13be   :  { %2530 = vrcp.f32 %v1269_v59 }
0x13cb   :  { %v2531_v60 = vpop.eup %2530 }
0x13cc   :  { %v1273_v62 = vmul.f32 0.0, %v2531_v60 }
0x142c   :  { %v1276_v61 = vpop.permute.xlu0 %1275 }
0x142d   :  { %v1278_v5 = vmul.f32 %v2531_v60, %v1276_v61 }
0x142f   :  { %1280 = vrot.lane.b32.xlu1 %v1278_v5, %s2601_s3 }
0x14a1   :  { %v1281_v6 = vpop.permute.xlu1 %1280 }
0x14a2   :  { %v1283_v63 = vadd.f32 %v1281_v6, %v1273_v62 }
0x14a4   :  { %2532 = vtanh.f32 %v1283_v63 }
0x14a5   :  { %2534 = vtanh.f32 %v1003_v48 }
0x14a6   :  { %2536 = vpow2.f32 %v2112_v3 }
0x14b1   :  { %v2533_v1 = vpop.eup %2532 }
0x14b2   :  { %1286 = vrot.lane.b32.xlu0 %v2533_v1, %s2600_s23  ;;  %v2535_v7 = vpop.eup %2534 }
0x14b3   :  { %v2537_v4 = vpop.eup %2536 }
0x14b4   :  { %v1007_v55 = vadd.f32 1.0, %v2537_v4  ;;  %v1163_v4 = vadd.f32 %v2360_v44, %v2933_v51 }
0x14b6   :  { %1013 = vrot.lane.b32.xlu0 %v2535_v7, %s2600_s23  ;;  %2538 = vrcp.f32 %v1007_v55 }
0x14c3   :  { %v2539_v11 = vpop.eup %2538 }
0x14c4   :  { %v1011_v15 = vmul.f32 %v2539_v11, %v2869_v58 }
0x1524   :  { %v1287_v8 = vpop.permute.xlu0 %1286 }
0x1525   :  { %v1289_v10 = vmul.f32 %v2531_v60, %v1287_v8 }
0x1527   :  { %1292 = vrot.lane.b32.xlu1 %v1289_v10, %s2601_s3 }
0x1528   :  { %v1014_v12 = vpop.permute.xlu0 %1013 }
0x1529   :  { %v1016_v13 = vmul.f32 %v2539_v11, %v1014_v12 }
0x152b   :  { %1018 = vrot.lane.b32.xlu0 %v1016_v13, %s2601_s3 }
0x1599   :  { %v1293_v14 = vpop.permute.xlu1 %1292 }
0x159a   :  { %2387 = vmatmul.mubr.msk.f32.vlgmr.msra.gmra.mxu1 %vm195_vm3, %v1293_v14 }
0x159b   :  { %2401 = vmatpush3.msra.mxu1 %v2876_v37  ;;  %2408 = vmatprep.mubr.msk.f32.mxu1 %vm2599_vm2, %v2598_v0 }
0x159c   :  { %2402 = vmatprep.subr.mxu1 %v2598_v0 }
0x159d   :  { %v1019_v16 = vpop.permute.xlu0 %1018  ;;  %2403 = vmatpush3.msra.mxu1 %v2882_v38 }
0x159e   :  { %v1021_v17 = vadd.f32 %v1019_v16, %v1011_v15  ;;  %2404 = vmatprep.subr.mxu1 %v2598_v0 }
0x159f   :  { %2405 = vmatpush3.msra.mxu1 %v2889_v39 }
0x15a0   :  { %2540 = vtanh.f32 %v1021_v17  ;;  %2406 = vmatprep.subr.mxu1 %v2598_v0 }
0x15a1   :  { %2407 = vmatpush3.msra.mxu1 %v2896_v40 }
0x15a2   :  { %2422 = vmatprep.subr.mxu1 %v2598_v0 }
0x15ad   :  { %v2541_v18 = vpop.eup %2540 }
0x15ae   :  { %1024 = vrot.lane.b32.xlu0 %v2541_v18, %s2600_s23 }
0x1620   :  { %v1025_v19 = vpop.permute.xlu0 %1024 }
0x1621   :  { %v1027_v20 = vmul.f32 %v2539_v11, %v1025_v19 }
0x1623   :  { %1029 = vrot.lane.b32.xlu0 %v1027_v20, %s2601_s3 }
0x165a   :  { %v1362_v22 = vpop.f32.mrf.mxu1 }
0x165b   :  { %v1366_v23 = vadd.f32 %v1362_v22, %v1153_v21 }
0x165c   :  { %v2388_v24 = vpop.f32.mrf.mxu1 }
0x165d   :  { %2542 = vtanh.f32 %v1366_v23  ;;  %v2124_v28 = vmul.f32 -1.442695, %v1366_v23 }
0x165f   :  { %2544 = vpow2.f32 %v2124_v28 }
0x166a   :  { %v2543_v25 = vpop.eup %2542 }
0x166b   :  { %1376 = vrot.lane.b32.xlu1 %v2543_v25, %s2600_s23  ;;  %v1168_v25 = vadd.f32 %v2933_v51, %v2979_v47  ;;  %v1173_v47 = vadd.f32 %v2977_v46, %v2933_v51 }
0x166c   :  { %v2545_v29 = vpop.eup %2544 }
0x166d   :  { %v1370_v30 = vadd.f32 1.0, %v2545_v29 }
0x166f   :  { %2546 = vrcp.f32 %v1370_v30 }
0x167c   :  { %v2547_v31 = vpop.eup %2546 }
0x167d   :  { %v1374_v34 = vmul.f32 %v2547_v31, %v1283_v63 }
0x1695   :  { %v1030_v26 = vpop.permute.xlu0 %1029 }
0x1696   :  { %1033 = vst.msk [vmem:[#allocation2 + $0x38] sm:$0xff] %vm195_vm3, %v1030_v26 }
0x169d   :  { %v1050_v27 = vld [vmem:[#allocation2 + $0x38] sm:$0xff] }
0x169e   :  { %2365 = vmatmul.mubr.msk.f32.gmra.mxu0 %vm195_vm3, %v1050_v27 }
0x169f   :  { %2397 = vmatprep.mubr.msk.f32.mxu0 %vm2599_vm2, %v2598_v0 }
0x16dd   :  { %v1377_v32 = vpop.permute.xlu1 %1376 }
0x16de   :  { %v1379_v33 = vmul.f32 %v2547_v31, %v1377_v32 }
0x16e0   :  { %1381 = vrot.lane.b32.xlu1 %v1379_v33, %s2601_s3 }
0x1752   :  { %v1382_v35 = vpop.permute.xlu1 %1381 }
0x1753   :  { %v1384_v58 = vadd.f32 %v1382_v35, %v1374_v34 }
0x1755   :  { %2548 = vtanh.f32 %v1384_v58 }
0x175e   :  { %v2981_v48 = vpop.f32.mrf.mxu0 }
0x1760   :  { %v2983_v49 = vpop.f32.mrf.mxu0 }
0x1762   :  { %v2549_v36 = vpop.eup %2548 }
0x1763   :  { %1387 = vrot.lane.b32.xlu1 %v2549_v36, %s2600_s23 }
0x17d5   :  { %v1388_v41 = vpop.permute.xlu1 %1387 }
0x17d6   :  { %v1390_v42 = vmul.f32 %v2547_v31, %v1388_v41 }
0x17d8   :  { %1393 = vrot.lane.b32.xlu1 %v1390_v42, %s2601_s3 }
0x184a   :  { %v1394_v43 = vpop.permute.xlu1 %1393 }
0x184b   :  { %2398 = vmatmul.mubr.msk.f32.vlgmr.msra.gmra.mxu0 %vm195_vm3, %v1394_v43 }
0x184c   :  { %2412 = vmatpush3.msra.mxu0 %v2876_v37  ;;  %2419 = vmatprep.mubr.msk.f32.mxu0 %vm2599_vm2, %v2598_v0 }
0x184d   :  { %2413 = vmatprep.subr.mxu0 %v2598_v0 }
0x184e   :  { %2414 = vmatpush3.msra.mxu0 %v2882_v38 }
0x184f   :  { %2415 = vmatprep.subr.mxu0 %v2598_v0 }
0x1850   :  { %2416 = vmatpush3.msra.mxu0 %v2889_v39 }
0x1851   :  { %2417 = vmatprep.subr.mxu0 %v2598_v0 }
0x1852   :  { %2418 = vmatpush3.msra.mxu0 %v2896_v40 }
0x1853   :  { %2433 = vmatprep.subr.mxu0 %v2598_v0 }
0x190b   :  { %v1463_v52 = vpop.f32.mrf.mxu0 }
0x190c   :  { %v1467_v53 = vadd.f32 %v1463_v52, %v1158_v50 }
0x190d   :  { %v2399_v54 = vpop.f32.mrf.mxu0 }
0x190e   :  { %2550 = vtanh.f32 %v1467_v53  ;;  %v2126_v56 = vmul.f32 -1.442695, %v1467_v53 }
0x1910   :  { %2552 = vpow2.f32 %v2126_v56 }
0x191b   :  { %v2551_v2 = vpop.eup %2550 }
0x191c   :  { %1477 = vrot.lane.b32.xlu0 %v2551_v2, %s2600_s23 }
0x191d   :  { %v2553_v9 = vpop.eup %2552 }
0x191e   :  { %v1471_v57 = vadd.f32 1.0, %v2553_v9 }
0x1920   :  { %2554 = vrcp.f32 %v1471_v57 }
0x192d   :  { %v2555_v59 = vpop.eup %2554 }
0x192e   :  { %v1475_v5 = vmul.f32 %v2555_v59, %v1384_v58 }
0x198e   :  { %v1478_v60 = vpop.permute.xlu0 %1477 }
0x198f   :  { %v1480_v61 = vmul.f32 %v2555_v59, %v1478_v60 }
0x1991   :  { %1482 = vrot.lane.b32.xlu1 %v1480_v61, %s2601_s3 }
0x1a03   :  { %v1483_v62 = vpop.permute.xlu1 %1482 }
0x1a04   :  { %v1485_v6 = vadd.f32 %v1483_v62, %v1475_v5  ;;  %v1178_v62 = vadd.f32 %v2933_v51, %v2983_v49 }
0x1a06   :  { %2556 = vtanh.f32 %v1485_v6 }
0x1a13   :  { %v2557_v63 = vpop.eup %2556 }
0x1a14   :  { %1488 = vrot.lane.b32.xlu0 %v2557_v63, %s2600_s23 }
0x1a86   :  { %v1489_v1 = vpop.permute.xlu0 %1488 }
0x1a87   :  { %v1491_v7 = vmul.f32 %v2555_v59, %v1489_v1 }
0x1a89   :  { %1494 = vrot.lane.b32.xlu1 %v1491_v7, %s2601_s3 }
0x1afb   :  { %v1495_v3 = vpop.permute.xlu1 %1494 }
0x1afc   :  { %2409 = vmatmul.mubr.msk.f32.vlgmr.msra.gmra.mxu1 %vm195_vm3, %v1495_v3 }
0x1afd   :  { %2423 = vmatpush3.msra.mxu1 %v2876_v37  ;;  %2430 = vmatprep.mubr.msk.f32.mxu1 %vm2599_vm2, %v2598_v0 }
0x1afe   :  { %2424 = vmatprep.subr.mxu1 %v2598_v0 }
0x1aff   :  { %2425 = vmatpush3.msra.mxu1 %v2882_v38 }
0x1b00   :  { %2426 = vmatprep.subr.mxu1 %v2598_v0 }
0x1b01   :  { %2427 = vmatpush3.msra.mxu1 %v2889_v39 }
0x1b02   :  { %2428 = vmatprep.subr.mxu1 %v2598_v0 }
0x1b03   :  { %2429 = vmatpush3.msra.mxu1 %v2896_v40 }
0x1b04   :  { %2444 = vmatprep.subr.mxu1 %v2598_v0 }
0x1bbc   :  { %v1564_v55 = vpop.f32.mrf.mxu1 }
0x1bbd   :  { %v1568_v8 = vadd.f32 %v1564_v55, %v1163_v4 }
0x1bbe   :  { %v2410_v10 = vpop.f32.mrf.mxu1 }
0x1bbf   :  { %2558 = vtanh.f32 %v1568_v8  ;;  %v2128_v12 = vmul.f32 -1.442695, %v1568_v8 }
0x1bc1   :  { %2560 = vpow2.f32 %v2128_v12 }
0x1bcc   :  { %v2559_v11 = vpop.eup %2558 }
0x1bcd   :  { %1578 = vrot.lane.b32.xlu0 %v2559_v11, %s2600_s23 }
0x1bce   :  { %v2561_v13 = vpop.eup %2560 }
0x1bcf   :  { %v1572_v14 = vadd.f32 1.0, %v2561_v13 }
0x1bd1   :  { %2562 = vrcp.f32 %v1572_v14 }
0x1bde   :  { %v2563_v15 = vpop.eup %2562 }
0x1bdf   :  { %v1576_v18 = vmul.f32 %v2563_v15, %v1485_v6 }
0x1c3f   :  { %v1579_v16 = vpop.permute.xlu0 %1578 }
0x1c40   :  { %v1581_v17 = vmul.f32 %v2563_v15, %v1579_v16 }
0x1c42   :  { %1583 = vrot.lane.b32.xlu1 %v1581_v17, %s2601_s3 }
0x1cb4   :  { %v1584_v19 = vpop.permute.xlu1 %1583 }
0x1cb5   :  { %v1586_v20 = vadd.f32 %v1584_v19, %v1576_v18  ;;  %v1183_v18 = vadd.f32 %v2981_v48, %v2933_v51  ;;  %v2000_v48 = vld [vmem:[%s3085_s7 + $0x18] sm:$0xff] }
0x1cb7   :  { %2564 = vtanh.f32 %v1586_v20 }
0x1cc4   :  { %v2565_v21 = vpop.eup %2564 }
0x1cc5   :  { %1589 = vrot.lane.b32.xlu0 %v2565_v21, %s2600_s23 }
0x1d37   :  { %v1590_v22 = vpop.permute.xlu0 %1589 }
0x1d38   :  { %v1592_v23 = vmul.f32 %v2563_v15, %v1590_v22 }
0x1d3a   :  { %1595 = vrot.lane.b32.xlu1 %v1592_v23, %s2601_s3 }
0x1dac   :  { %v1596_v24 = vpop.permute.xlu1 %1595 }
0x1dad   :  { %2420 = vmatmul.mubr.msk.f32.vlgmr.msra.gmra.mxu0 %vm195_vm3, %v1596_v24 }
0x1dae   :  { %2434 = vmatpush3.msra.mxu0 %v2876_v37  ;;  %2441 = vmatprep.mubr.msk.f32.mxu0 %vm2599_vm2, %v2598_v0 }
0x1daf   :  { %2435 = vmatprep.subr.mxu0 %v2598_v0 }
0x1db0   :  { %2436 = vmatpush3.msra.mxu0 %v2882_v38 }
0x1db1   :  { %2437 = vmatprep.subr.mxu0 %v2598_v0 }
0x1db2   :  { %2438 = vmatpush3.msra.mxu0 %v2889_v39 }
0x1db3   :  { %2439 = vmatprep.subr.mxu0 %v2598_v0 }
0x1db4   :  { %2440 = vmatpush3.msra.mxu0 %v2896_v40 }
0x1db5   :  { %2455 = vmatprep.subr.mxu0 %v2598_v0 }
0x1e6d   :  { %v1665_v26 = vpop.f32.mrf.mxu0 }
0x1e6e   :  { %v1669_v27 = vadd.f32 %v1665_v26, %v1168_v25 }
0x1e6f   :  { %v2421_v28 = vpop.f32.mrf.mxu0 }
0x1e70   :  { %2566 = vtanh.f32 %v1669_v27  ;;  %v2130_v30 = vmul.f32 -1.442695, %v1669_v27 }
0x1e72   :  { %2568 = vpow2.f32 %v2130_v30 }
0x1e7d   :  { %v2567_v29 = vpop.eup %2566 }
0x1e7e   :  { %1679 = vrot.lane.b32.xlu0 %v2567_v29, %s2600_s23 }
0x1e7f   :  { %v2569_v31 = vpop.eup %2568 }
0x1e80   :  { %v1673_v32 = vadd.f32 1.0, %v2569_v31  ;;  %v1999_v31 = vld [vmem:[%s3085_s7 + $0x10] sm:$0xff] }
0x1e82   :  { %2570 = vrcp.f32 %v1673_v32  ;;  %v1998_v32 = vld [vmem:[%s3085_s7 + $0x8] sm:$0xff] }
0x1e8f   :  { %v2571_v33 = vpop.eup %2570 }
0x1e90   :  { %v1677_v58 = vmul.f32 %v2571_v33, %v1586_v20 }
0x1ef0   :  { %v1680_v34 = vpop.permute.xlu0 %1679 }
0x1ef1   :  { %v1682_v35 = vmul.f32 %v2571_v33, %v1680_v34 }
0x1ef3   :  { %1684 = vrot.lane.b32.xlu1 %v1682_v35, %s2601_s3 }
0x1f65   :  { %v1685_v36 = vpop.permute.xlu1 %1684 }
0x1f66   :  { %v1687_v41 = vadd.f32 %v1685_v36, %v1677_v58 }
0x1f68   :  { %2572 = vtanh.f32 %v1687_v41 }
0x1f75   :  { %v2573_v42 = vpop.eup %2572 }
0x1f76   :  { %1690 = vrot.lane.b32.xlu0 %v2573_v42, %s2600_s23 }
0x1fe8   :  { %v1691_v43 = vpop.permute.xlu0 %1690 }
0x1fe9   :  { %v1693_v44 = vmul.f32 %v2571_v33, %v1691_v43  ;;  %v1997_v33 = vld [vmem:[%s3085_s7] sm:$0xff] }
0x1feb   :  { %1696 = vrot.lane.b32.xlu1 %v1693_v44, %s2601_s3 }
0x205d   :  { %v1697_v45 = vpop.permute.xlu1 %1696 }
0x205e   :  { %2431 = vmatmul.mubr.msk.f32.vlgmr.msra.gmra.mxu1 %vm195_vm3, %v1697_v45 }
0x205f   :  { %2445 = vmatpush3.msra.mxu1 %v2876_v37  ;;  %2452 = vmatprep.mubr.msk.f32.mxu1 %vm2599_vm2, %v2598_v0 }
0x2060   :  { %2446 = vmatprep.subr.mxu1 %v2598_v0 }
0x2061   :  { %2447 = vmatpush3.msra.mxu1 %v2882_v38 }
0x2062   :  { %2448 = vmatprep.subr.mxu1 %v2598_v0 }
0x2063   :  { %2449 = vmatpush3.msra.mxu1 %v2889_v39 }
0x2064   :  { %2450 = vmatprep.subr.mxu1 %v2598_v0 }
0x2065   :  { %2451 = vmatpush3.msra.mxu1 %v2896_v40 }
0x211e   :  { %v1766_v50 = vpop.f32.mrf.mxu1 }
0x211f   :  { %v1770_v37 = vadd.f32 %v1766_v50, %v1173_v47 }
0x2120   :  { %v2432_v52 = vpop.f32.mrf.mxu1 }
0x2121   :  { %2574 = vtanh.f32 %v1770_v37  ;;  %v2132_v54 = vmul.f32 -1.442695, %v1770_v37 }
0x2123   :  { %2576 = vpow2.f32 %v2132_v54 }
0x212e   :  { %v2575_v53 = vpop.eup %2574 }
0x212f   :  { %1780 = vrot.lane.b32.xlu0 %v2575_v53, %s2600_s23 }
0x2130   :  { %v2577_v38 = vpop.eup %2576 }
0x2131   :  { %v1774_v2 = vadd.f32 1.0, %v2577_v38 }
0x2133   :  { %2578 = vrcp.f32 %v1774_v2 }
0x2140   :  { %v2579_v39 = vpop.eup %2578 }
0x2141   :  { %v1778_v40 = vmul.f32 %v2579_v39, %v1687_v41  ;;  %v2137_v41 = vld [vmem:[%s3086_s8] ss:$0 sm:$0xff] }
0x21a1   :  { %v1781_v56 = vpop.permute.xlu0 %1780 }
0x21a2   :  { %v1783_v9 = vmul.f32 %v2579_v39, %v1781_v56 }
0x21a4   :  { %1785 = vrot.lane.b32.xlu1 %v1783_v9, %s2601_s3 }
0x2216   :  { %v1786_v57 = vpop.permute.xlu1 %1785 }
0x2217   :  { %v1788_v46 = vadd.f32 %v1786_v57, %v1778_v40 }
0x2219   :  { %2580 = vtanh.f32 %v1788_v46 }
0x2226   :  { %v2581_v59 = vpop.eup %2580 }
0x2227   :  { %1791 = vrot.lane.b32.xlu0 %v2581_v59, %s2600_s23 }
0x2299   :  { %v1792_v60 = vpop.permute.xlu0 %1791 }
0x229a   :  { %v1794_v61 = vmul.f32 %v2579_v39, %v1792_v60 }
0x229c   :  { %1797 = vrot.lane.b32.xlu1 %v1794_v61, %s2601_s3 }
0x230e   :  { %v1798_v5 = vpop.permute.xlu1 %1797 }
0x230f   :  { %2442 = vmatmul.mubr.msk.f32.vlgmr.msra.gmra.mxu0 %vm195_vm3, %v1798_v5 }
0x2310   :  { %2463 = vmatprep.mubr.msk.f32.mxu0 %vm2599_vm2, %v2598_v0  ;;  %2456 = vmatpush3.msra.mxu0 %v2000_v48 }
0x2311   :  { %2457 = vmatprep.subr.mxu0 %v2598_v0 }
0x2312   :  { %2458 = vmatpush3.msra.mxu0 %v1999_v31 }
0x2313   :  { %2459 = vmatprep.subr.mxu0 %v2598_v0 }
0x2314   :  { %2460 = vmatpush3.msra.mxu0 %v1998_v32 }
0x2315   :  { %2461 = vmatprep.subr.mxu0 %v2598_v0 }
0x2316   :  { %2462 = vmatpush3.msra.mxu0 %v1997_v33 }
0x23cf   :  { %v1867_v6 = vpop.f32.mrf.mxu0 }
0x23d0   :  { %v1871_v63 = vadd.f32 %v1867_v6, %v1178_v62 }
0x23d1   :  { %v2443_v1 = vpop.f32.mrf.mxu0 }
0x23d2   :  { %2582 = vtanh.f32 %v1871_v63  ;;  %v2134_v3 = vmul.f32 -1.442695, %v1871_v63 }
0x23d4   :  { %2584 = vpow2.f32 %v2134_v3 }
0x23df   :  { %v2583_v7 = vpop.eup %2582 }
0x23e0   :  { %1881 = vrot.lane.b32.xlu0 %v2583_v7, %s2600_s23 }
0x23e1   :  { %v2585_v4 = vpop.eup %2584 }
0x23e2   :  { %v1875_v55 = vadd.f32 1.0, %v2585_v4 }
0x23e4   :  { %2586 = vrcp.f32 %v1875_v55 }
0x23f1   :  { %v2587_v8 = vpop.eup %2586 }
0x23f2   :  { %v1879_v12 = vmul.f32 %v2587_v8, %v1788_v46 }
0x2452   :  { %v1882_v10 = vpop.permute.xlu0 %1881 }
0x2453   :  { %v1884_v11 = vmul.f32 %v2587_v8, %v1882_v10 }
0x2455   :  { %1886 = vrot.lane.b32.xlu1 %v1884_v11, %s2601_s3 }
0x24c7   :  { %v1887_v13 = vpop.permute.xlu1 %1886 }
0x24c8   :  { %v1889_v49 = vadd.f32 %v1887_v13, %v1879_v12 }
0x24ca   :  { %2588 = vtanh.f32 %v1889_v49 }
0x24d7   :  { %v2589_v14 = vpop.eup %2588 }
0x24d8   :  { %1892 = vrot.lane.b32.xlu0 %v2589_v14, %s2600_s23 }
0x254a   :  { %v1893_v15 = vpop.permute.xlu0 %1892 }
0x254b   :  { %v1895_v16 = vmul.f32 %v2587_v8, %v1893_v15 }
0x254d   :  { %1898 = vrot.lane.b32.xlu1 %v1895_v16, %s2601_s3 }
0x25bf   :  { %v1899_v17 = vpop.permute.xlu1 %1898 }
0x25c0   :  { %2453 = vmatmul.mubr.msk.f32.vlgmr.msra.gmra.mxu1 %vm195_vm3, %v1899_v17 }
0x2680   :  { %v1968_v19 = vpop.f32.mrf.mxu1 }
0x2681   :  { %v1972_v20 = vadd.f32 %v1968_v19, %v1183_v18 }
0x2682   :  { %v2454_v21 = vpop.f32.mrf.mxu1 }
0x2683   :  { %2590 = vtanh.f32 %v1972_v20  ;;  %v2136_v23 = vmul.f32 -1.442695, %v1972_v20 }
0x2685   :  { %2592 = vpow2.f32 %v2136_v23 }
0x2690   :  { %v2591_v22 = vpop.eup %2590 }
0x2691   :  { %1982 = vrot.lane.b32.xlu0 %v2591_v22, %s2600_s23 }
0x2692   :  { %v2593_v24 = vpop.eup %2592 }
0x2693   :  { %v1976_v25 = vadd.f32 1.0, %v2593_v24 }
0x2695   :  { %2594 = vrcp.f32 %v1976_v25 }
0x26a2   :  { %v2595_v26 = vpop.eup %2594 }
0x26a3   :  { %v1980_v29 = vmul.f32 %v2595_v26, %v1889_v49 }
0x2703   :  { %v1983_v27 = vpop.permute.xlu0 %1982 }
0x2704   :  { %v1985_v28 = vmul.f32 %v2595_v26, %v1983_v27 }
0x2706   :  { %1987 = vrot.lane.b32.xlu1 %v1985_v28, %s2601_s3 }
0x2778   :  { %v1988_v30 = vpop.permute.xlu1 %1987 }
0x2779   :  { %v1990_v51 = vadd.f32 %v1988_v30, %v1980_v29 }
0x277b   :  { %2596 = vtanh.f32 %v1990_v51 }
0x2788   :  { %v2597_v34 = vpop.eup %2596 }
0x2789   :  { %1993 = vrot.lane.b32.xlu0 %v2597_v34, %s2600_s23 }
0x27fb   :  { %v1994_v35 = vpop.permute.xlu0 %1993 }
0x27fc   :  { %v1996_v58 = vmul.f32 %v2595_v26, %v1994_v35 }
0x27fe   :  { %2009 = vrot.lane.b32.xlu1 %v1996_v58, %s2601_s3 }
0x2870   :  { %v2010_v36 = vpop.permute.xlu1 %2009 }
0x2871   :  { %2464 = vmatmul.mubr.msk.f32.vlgmr.msra.gmra.mxu0 %vm195_vm3, %v2010_v36 }
0x2931   :  { %v2079_v42 = vpop.f32.mrf.mxu0 }
0x2932   :  { %v2080_v43 = vadd.f32 %v2137_v41, %v2079_v42 }
0x2933   :  { %v2465_v44 = vpop.f32.mrf.mxu0 }
0x2934   :  { %2083 = vst.msk [vmem:[%s3087_s9] sm:$0xff] %vm52_vm1, %v2080_v43 }

</bundles_post_ra>
